<compile_context>
chip_gen: v5e
topology: v5e:2x2
jax: 0.10.0
libtpu: 0.0.40
codegen_flags: <defaults>
</compile_context>

<pallas_src>
import functools

import jax
import jax.numpy as jnp
from jax.experimental import pallas as pl
from jax.experimental.pallas import tpu as pltpu

LANES = 128                  # channel lane padding (all true C <= 128 here)
_IO_DTYPE = jnp.float32      # set jnp.bfloat16 on v6e/v7x; keep f32 for tight check


def _apply_act(y, act):
    if act == "relu":
        return jnp.maximum(y, 0.0)
    if act == "relu6":
        return jnp.clip(y, 0.0, 6.0)
    return y                 # act None -> identity


# ----------------------------------------------------------------------------
# The single fused Pallas kernel (one grid step == one image)
# ----------------------------------------------------------------------------
def backbone_kernel(p_ref, wstem_ref, w1_ref, wdw1_ref, w3_ref, wdw2_ref,
                    w2_ref, b_ref, s0_ref, s1_ref, s2_ref,
                    pad_ref, dw1_ref, dw2_ref, *, H, W, k, acts):
    """Whole backbone for ONE image.

    Flat spatial layout: feature maps live as (H*W, 128) row-major (h, w) with
    channels zero-padded to 128 lanes.  `pad_ref` is a zero-filled (Hp*Wp, 128)
    VMEM scratch reused as the spatially padded map for both depthwise convs,
    so every 3x3 tap is a statically-offset (optionally strided) row read.
    Padded lanes stay exactly zero through every layer (weights/biases are
    zero-padded), which keeps the residual add and stage2 exact.
    """
    f32 = jnp.float32
    pad = k // 2
    Wp = W + 2 * pad
    Ho, Wo = H // 2, W // 2                      # MBV1 stride-2 output size

    # ---- stage0: stem = ONE (H*W, k*k*Cin) @ (k*k*Cin, 128) dot + bias + relu --
    h0 = jnp.dot(p_ref[...].astype(f32), wstem_ref[...],
                 preferred_element_type=f32)
    h0 = _apply_act(h0 + b_ref[0:1], acts[0])                     # (H*W, 128)
    s0_ref[...] = h0.astype(s0_ref.dtype)

    # ---- stage1: MBV2 (1x1 expand -> 3x3/s1 depthwise -> 1x1 project) + identity
    mid = jnp.dot(h0, w1_ref[...], preferred_element_type=f32)
    mid = _apply_act(mid + b_ref[1:2], acts[1])                   # (H*W, 128)

    pad_ref[...] = jnp.zeros_like(pad_ref)       # zero ring == conv zero padding
    for oh in range(H):                          # scatter real rows -> interior
        pad_ref[pl.ds((oh + pad) * Wp + pad, W), :] = mid[oh * W:(oh + 1) * W, :]

    taps1 = [wdw1_ref[t:t + 1, :] for t in range(k * k)]
    b_dw1 = b_ref[2:3]
    for oh in range(H):                          # depthwise on real rows only
        acc = jnp.zeros((W, LANES), f32)
        for kh in range(k):
            base = (oh + kh) * Wp
            for kw in range(k):
                acc = acc + pad_ref[pl.ds(base + kw, W), :] * taps1[kh * k + kw]
        dw1_ref[pl.ds(oh * W, W), :] = _apply_act(acc + b_dw1, acts[2])

    y1 = jnp.dot(dw1_ref[...], w3_ref[...], preferred_element_type=f32)
    y1 = _apply_act(y1 + b_ref[3:4], acts[3]) + h0                # identity shortcut
    s1_ref[...] = y1.astype(s1_ref.dtype)

    # ---- stage2: MBV1 (3x3/s2 depthwise -> 1x1 project) -----------------------
    pad_ref[...] = jnp.zeros_like(pad_ref)
    for oh in range(H):
        pad_ref[pl.ds((oh + pad) * Wp + pad, W), :] = y1[oh * W:(oh + 1) * W, :]

    taps2 = [wdw2_ref[t:t + 1, :] for t in range(k * k)]
    b_dw2 = b_ref[4:5]
    for oh in range(Ho):
        acc = jnp.zeros((Wo, LANES), f32)
        for kh in range(k):
            base = (2 * oh + kh) * Wp
            for kw in range(k):
                acc = acc + (pad_ref[pl.ds(base + kw, Wo, stride=2), :]
                             * taps2[kh * k + kw])
        dw2_ref[pl.ds(oh * Wo, Wo), :] = _apply_act(acc + b_dw2, acts[4])

    y2 = jnp.dot(dw2_ref[...], w2_ref[...], preferred_element_type=f32)
    s2_ref[...] = _apply_act(y2 + b_ref[5:6], acts[5]).astype(s2_ref.dtype)


# ----------------------------------------------------------------------------
# pallas_call wrapper
# ----------------------------------------------------------------------------
def _fused_backbone_call(patches, wstem, w1, wdw1, w3, wdw2, w2, biases,
                         n, H, W, k, acts):
    pad = k // 2
    Hp, Wp = H + 2 * pad, W + 2 * pad
    M0, M2 = H * W, (H // 2) * (W // 2)
    assert M0 % 8 == 0 and M2 % 8 == 0
    # TODO(synk): for large H*W, grid over row blocks with a (pad*Wp)-row halo
    # instead of whole-image residency; here each per-image map is ~50 KiB.
    assert Hp * Wp * LANES * 4 < 8 * 2 ** 20, "feature map too large for fused kernel"

    kernel = functools.partial(backbone_kernel, H=H, W=W, k=k, acts=acts)

    def _const(a):           # whole-array weight block, identical for every step
        return pl.BlockSpec(a.shape, lambda i: (0, 0))

    return pl.pallas_call(
        kernel,
        out_shape=(jax.ShapeDtypeStruct((n * M0, LANES), _IO_DTYPE),
                   jax.ShapeDtypeStruct((n * M0, LANES), _IO_DTYPE),
                   jax.ShapeDtypeStruct((n * M2, LANES), _IO_DTYPE)),
        grid=(n,),
        in_specs=[pl.BlockSpec((M0, patches.shape[1]), lambda i: (i, 0)),
                  _const(wstem), _const(w1), _const(wdw1), _const(w3),
                  _const(wdw2), _const(w2), _const(biases)],
        out_specs=(pl.BlockSpec((M0, LANES), lambda i: (i, 0)),
                   pl.BlockSpec((M0, LANES), lambda i: (i, 0)),
                   pl.BlockSpec((M2, LANES), lambda i: (i, 0))),
        scratch_shapes=[pltpu.VMEM((Hp * Wp, LANES), jnp.float32),   # padded map
                        pltpu.VMEM((M0, LANES), jnp.float32),        # MBV2 dw out
                        pltpu.VMEM((M2, LANES), jnp.float32)],       # MBV1 dw out
        compiler_params=pltpu.CompilerParams(
            dimension_semantics=("parallel",)),
    )(patches.astype(_IO_DTYPE), wstem, w1, wdw1, w3, wdw2, w2, biases)


# ----------------------------------------------------------------------------
# Host-side glue: stem im2col, BN-folded weight packing, init, composition
# ----------------------------------------------------------------------------
def _stem_patches(x_nhwc, k, stride, pad):
    """(N,H,W,Cin) -> ((N*Ho*Wo, k*k*Cin) patches, (N,Ho,Wo)); tap-major, Cin-minor.

    Only used for the stem: the raw 3-channel input is tiny (no lane padding),
    so host-side patch building costs ~nothing and keeps the kernel simple.
    """
    x = jnp.pad(x_nhwc, ((0, 0), (pad, pad), (pad, pad), (0, 0)))
    n, hp, wp, c = x.shape
    ho = (hp - k) // stride + 1
    wo = (wp - k) // stride + 1
    cols = []
    for kh in range(k):
        for kw in range(k):
            sl = jax.lax.slice(
                x, (0, kh, kw, 0),
                (n, kh + stride * (ho - 1) + 1, kw + stride * (wo - 1) + 1, c),
                (1, stride, stride, 1))
            cols.append(sl.reshape(n * ho * wo, c))
    return jnp.concatenate(cols, axis=-1), (n, ho, wo)


def _pad_cols(a):
    return jnp.pad(a, ((0, 0), (0, LANES - a.shape[1])))


def _prep_dense(p):
    """(cout,cin,k,k) -> (k*k*cin, 128) with eval-BN scale folded into columns."""
    k, cin, cout = p["k"], p["cin"], p["cout"]
    w = jnp.transpose(p["w"], (2, 3, 1, 0)).reshape(k * k * cin, cout)
    return _pad_cols(w * p["scale"][None, :])


def _prep_pointwise(p):
    """1x1 conv (cout,cin,1,1) -> (128,128), BN scale folded into columns."""
    w = jnp.transpose(p["w"][:, :, 0, 0], (1, 0)) * p["scale"][None, :]
    return jnp.pad(w, ((0, LANES - w.shape[0]), (0, LANES - w.shape[1])))


def _prep_depthwise(p):
    """depthwise (c,1,k,k) -> (k*k, 128), BN scale folded into channels."""
    k = p["k"]
    w = jnp.transpose(p["w"][:, 0, :, :], (1, 2, 0)).reshape(k * k, p["cout"])
    return _pad_cols(w * p["scale"][None, :])


def _pack_biases(layers, rows=8):
    bs = [jnp.pad(p["bias"], (0, LANES - p["bias"].shape[0])) for p in layers]
    while len(bs) < rows:
        bs.append(jnp.zeros((LANES,), jnp.float32))
    return jnp.stack(bs, axis=0).astype(jnp.float32)        # (8, 128)


def init_conv_layer(key, cin, cout, k, stride, groups=1, act="relu"):
    """ConvLayer(cin, cout, k, stride, groups, bias=False, norm='bn_2d', act)."""
    k1, k2, k3, k4, k5 = jax.random.split(key, 5)
    w = 0.1 * jax.random.normal(k1, (cout, cin // groups, k, k), jnp.float32)
    gamma = 1.0 + 0.1 * jax.random.normal(k2, (cout,), jnp.float32)
    beta = 0.1 * jax.random.normal(k3, (cout,), jnp.float32)
    r_mean = 0.1 * jax.random.normal(k4, (cout,), jnp.float32)
    r_var = 1.0 + 0.1 * jnp.abs(jax.random.normal(k5, (cout,), jnp.float32))
    scale = gamma / jnp.sqrt(r_var + 1e-5)    # eval-mode BN folded to scale/bias
    bias = beta - r_mean * scale
    return dict(w=w, scale=scale, bias=bias, k=k, stride=stride, groups=groups,
                act=act, cin=cin, cout=cout)


def init_mbv2_block(key, cin, cout, k=3, stride=1, expand_ratio=2):
    mid = int((cin * expand_ratio + 4) // 8 * 8)   # make_divisible(., 8)
    k1, k2, k3 = jax.random.split(key, 3)
    return dict(
        type="mbv2",
        inverted=init_conv_layer(k1, cin, mid, 1, 1, act="relu6"),
        depth=init_conv_layer(k2, mid, mid, k, stride, groups=mid, act="relu6"),
        point=init_conv_layer(k3, mid, cout, 1, 1, act=None),
    )


def init_mbv1_block(key, cin, cout, k=3, stride=1):
    k1, k2 = jax.random.split(key, 2)
    return dict(
        type="mbv1",
        depth=init_conv_layer(k1, cin, cin, k, stride, groups=cin, act="relu6"),
        point=init_conv_layer(k2, cin, cout, 1, 1, act=None),
    )


def seq_backbone_forward(x_nchw, params):
    """SeqBackbone.forward: {'input','stage0','stage1','stage2','output'} in NCHW."""
    stem = params["input_stem"]
    res, mbv1 = params["stages"]
    assert res["type"] == "residual" and res["conv"]["type"] == "mbv2"
    assert mbv1["type"] == "mbv1"
    blk2 = res["conv"]
    assert blk2["depth"]["stride"] == 1 and mbv1["depth"]["stride"] == 2
    assert blk2["depth"]["k"] == mbv1["depth"]["k"]
    kdw = blk2["depth"]["k"]

    out = {"input": x_nchw}
    x = jnp.transpose(x_nchw, (0, 2, 3, 1)).astype(jnp.float32)   # NCHW -> NHWC

    patches, (n, H, W) = _stem_patches(x, stem["k"], stem["stride"], stem["k"] // 2)
    assert H % 2 == 0 and W % 2 == 0

    wstem = _prep_dense(stem)
    w1 = _prep_pointwise(blk2["inverted"])
    wdw1 = _prep_depthwise(blk2["depth"])
    w3 = _prep_pointwise(blk2["point"])
    wdw2 = _prep_depthwise(mbv1["depth"])
    w2 = _prep_pointwise(mbv1["point"])
    biases = _pack_biases([stem, blk2["inverted"], blk2["depth"], blk2["point"],
                           mbv1["depth"], mbv1["point"]])
    acts = (stem["act"], blk2["inverted"]["act"], blk2["depth"]["act"],
            blk2["point"]["act"], mbv1["depth"]["act"], mbv1["point"]["act"])

    s0, s1, s2 = _fused_backbone_call(patches, wstem, w1, wdw1, w3, wdw2, w2,
                                      biases, n, H, W, kdw, acts)

    def to_nchw(flat, h, w, c):
        y = flat.reshape(n, h, w, LANES)[..., :c].astype(jnp.float32)
        return jnp.transpose(y, (0, 3, 1, 2))

    out["stage0"] = to_nchw(s0, H, W, stem["cout"])
    out["stage1"] = to_nchw(s1, H, W, blk2["point"]["cout"])
    out["stage2"] = to_nchw(s2, H // 2, W // 2, mbv1["point"]["cout"])
    out["output"] = out["stage2"]
    return out


# ----------------------------------------------------------------------------
# Pure-JAX reference (lax.conv, HIGHEST precision) for the numerical check
# ----------------------------------------------------------------------------
def _ref_conv_layer(x_nhwc, p):
    pad = p["k"] // 2
    w_hwio = jnp.transpose(p["w"], (2, 3, 1, 0))
    y = jax.lax.conv_general_dilated(
        x_nhwc, w_hwio, (p["stride"], p["stride"]), [(pad, pad), (pad, pad)],
        dimension_numbers=("NHWC", "HWIO", "NHWC"),
        feature_group_count=p["groups"],
        precision=jax.lax.Precision.HIGHEST)
    return _apply_act(y * p["scale"] + p["bias"], p["act"])


def _ref_block(x, blk):
    if blk["type"] == "mbv2":
        return _ref_conv_layer(_ref_conv_layer(_ref_conv_layer(x, blk["inverted"]),
                                               blk["depth"]), blk["point"])
    return _ref_conv_layer(_ref_conv_layer(x, blk["depth"]), blk["point"])


def _ref_forward(x_nchw, params):
    out = {}
    x = jnp.transpose(x_nchw, (0, 2, 3, 1))
    x = _ref_conv_layer(x, params["input_stem"])
    out["stage0"] = jnp.transpose(x, (0, 3, 1, 2))
    for sid, stage in enumerate(params["stages"], 1):
        if stage["type"] == "residual":
            x = _ref_block(x, stage["conv"]) + x
        else:
            x = _ref_block(x, stage)
        out["stage%d" % sid] = jnp.transpose(x, (0, 3, 1, 2))
    out["output"] = out["stage%d" % len(params["stages"])]
    return out


# ----------------------------------------------------------------------------
if __name__ == "__main__":
    key = jax.random.PRNGKey(0)
    kx, ks, k1, k2 = jax.random.split(key, 4)

    # Small NCHW input consistent with a conv backbone.
    x = jax.random.normal(kx, (2, 3, 16, 16), jnp.float32)

    params = dict(
        input_stem=init_conv_layer(ks, 3, 8, k=3, stride=2, act="relu"),
        stages=[
            dict(type="residual",
                 conv=init_mbv2_block(k1, 8, 8, k=3, stride=1, expand_ratio=2)),
            init_mbv1_block(k2, 8, 16, k=3, stride=2),
        ],
    )

    out = jax.jit(lambda xx: seq_backbone_forward(xx, params))(x)
    jax.block_until_ready(out["output"])

    # Shape checks (PyTorch NCHW semantics).
    assert out["input"].shape == (2, 3, 16, 16)
    assert out["stage0"].shape == (2, 8, 8, 8)
    assert out["stage1"].shape == (2, 8, 8, 8)
    assert out["stage2"].shape == (2, 16, 4, 4)
    assert out["output"].shape == (2, 16, 4, 4)

    # Numerical check against the pure-JAX reference (f32 path).
    ref = jax.jit(lambda xx: _ref_forward(xx, params))(x)
    jax.block_until_ready(ref["output"])
    for name in ("stage0", "stage1", "stage2", "output"):
        assert jnp.allclose(out[name].astype(jnp.float32), ref[name],
                            atol=2e-3, rtol=2e-3), "mismatch vs reference: " + name

    print("KERNEL_OK")
</pallas_src>

<mosaic_0001>
module attributes {stable_mosaic.version = 11 : i64} {
  func.func @backbone_kernel(%arg0: i32, %arg1: memref<64x27xf32, #tpu.memory_space<vmem>>, %arg2: memref<27x128xf32, #tpu.memory_space<vmem>>, %arg3: memref<128x128xf32, #tpu.memory_space<vmem>>, %arg4: memref<9x128xf32, #tpu.memory_space<vmem>>, %arg5: memref<128x128xf32, #tpu.memory_space<vmem>>, %arg6: memref<9x128xf32, #tpu.memory_space<vmem>>, %arg7: memref<128x128xf32, #tpu.memory_space<vmem>>, %arg8: memref<8x128xf32, #tpu.memory_space<vmem>>, %arg9: memref<64x128xf32, #tpu.memory_space<vmem>>, %arg10: memref<64x128xf32, #tpu.memory_space<vmem>>, %arg11: memref<16x128xf32, #tpu.memory_space<vmem>>, %arg12: memref<100x128xf32, #tpu.memory_space<vmem>>, %arg13: memref<64x128xf32, #tpu.memory_space<vmem>>, %arg14: memref<16x128xf32, #tpu.memory_space<vmem>>) attributes {dimension_semantics = [#tpu.dimension_semantics<parallel>], iteration_bounds = array<i64: 2>, scalar_prefetch = 0 : i64, scratch_operands = 3 : i64, tpu.core_type = #tpu.core_type<tc>, window_params = [{transform_indices = @transform_0, window_bounds = array<i64: 64, 27>}, {pipeline_mode = #tpu.pipeline_mode<synchronous>, transform_indices = @transform_1, window_bounds = array<i64: 27, 128>}, {pipeline_mode = #tpu.pipeline_mode<synchronous>, transform_indices = @transform_2, window_bounds = array<i64: 128, 128>}, {pipeline_mode = #tpu.pipeline_mode<synchronous>, transform_indices = @transform_3, window_bounds = array<i64: 9, 128>}, {pipeline_mode = #tpu.pipeline_mode<synchronous>, transform_indices = @transform_4, window_bounds = array<i64: 128, 128>}, {pipeline_mode = #tpu.pipeline_mode<synchronous>, transform_indices = @transform_5, window_bounds = array<i64: 9, 128>}, {pipeline_mode = #tpu.pipeline_mode<synchronous>, transform_indices = @transform_6, window_bounds = array<i64: 128, 128>}, {pipeline_mode = #tpu.pipeline_mode<synchronous>, transform_indices = @transform_7, window_bounds = array<i64: 8, 128>}, {transform_indices = @transform_8, window_bounds = array<i64: 64, 128>}, {transform_indices = @transform_9, window_bounds = array<i64: 64, 128>}, {transform_indices = @transform_10, window_bounds = array<i64: 16, 128>}]} {
    %c0 = arith.constant 0 : index
    %c0_0 = arith.constant 0 : index
    %0 = vector.load %arg1[%c0, %c0_0] : memref<64x27xf32, #tpu.memory_space<vmem>>, vector<64x27xf32>
    %c0_1 = arith.constant 0 : index
    %c0_2 = arith.constant 0 : index
    %1 = vector.load %arg2[%c0_1, %c0_2] : memref<27x128xf32, #tpu.memory_space<vmem>>, vector<27x128xf32>
    %cst = arith.constant dense<0.000000e+00> : vector<64x128xf32>
    %2 = tpu.matmul %0, %1, %cst {dimension_numbers = #tpu.dot_dimension_numbers<[1], [0], [0], [1], [0, 0, 1, 1], [], []>} : vector<64x27xf32>, vector<27x128xf32>, vector<64x128xf32> -> vector<64x128xf32>
    %c0_3 = arith.constant 0 : index
    %c0_4 = arith.constant 0 : index
    %3 = vector.load %arg8[%c0_3, %c0_4] : memref<8x128xf32, #tpu.memory_space<vmem>>, vector<1x128xf32>
    %4 = vector.broadcast %3 : vector<1x128xf32> to vector<64x128xf32>
    %5 = arith.addf %2, %4 : vector<64x128xf32>
    %cst_5 = arith.constant 0.000000e+00 : f32
    %6 = vector.broadcast %cst_5 : f32 to vector<64x128xf32>
    %7 = arith.maximumf %5, %6 : vector<64x128xf32>
    %c0_6 = arith.constant 0 : index
    %c0_7 = arith.constant 0 : index
    %8 = vector.load %arg9[%c0_6, %c0_7] : memref<64x128xf32, #tpu.memory_space<vmem>>, vector<64x128xf32>
    tpu.vector_store %arg9[%c0_6, %c0_7], %7 {strides = array<i32>} : memref<64x128xf32, #tpu.memory_space<vmem>>, vector<64x128xf32>,
    %c0_8 = arith.constant 0 : index
    %c0_9 = arith.constant 0 : index
    %9 = vector.load %arg3[%c0_8, %c0_9] : memref<128x128xf32, #tpu.memory_space<vmem>>, vector<128x128xf32>
    %cst_10 = arith.constant dense<0.000000e+00> : vector<64x128xf32>
    %10 = tpu.matmul %7, %9, %cst_10 {dimension_numbers = #tpu.dot_dimension_numbers<[1], [0], [0], [1], [0, 0, 1, 1], [], []>} : vector<64x128xf32>, vector<128x128xf32>, vector<64x128xf32> -> vector<64x128xf32>
    %c1 = arith.constant 1 : index
    %c0_11 = arith.constant 0 : index
    %11 = vector.load %arg8[%c1, %c0_11] : memref<8x128xf32, #tpu.memory_space<vmem>>, vector<1x128xf32>
    %12 = vector.broadcast %11 : vector<1x128xf32> to vector<64x128xf32>
    %13 = arith.addf %10, %12 : vector<64x128xf32>
    %cst_12 = arith.constant 0.000000e+00 : f32
    %cst_13 = arith.constant 6.000000e+00 : f32
    %14 = vector.broadcast %cst_12 : f32 to vector<64x128xf32>
    %15 = arith.maximumf %14, %13 : vector<64x128xf32>
    %16 = vector.broadcast %cst_13 : f32 to vector<64x128xf32>
    %17 = arith.minimumf %16, %15 : vector<64x128xf32>
    %cst_14 = arith.constant 0.000000e+00 : f32
    %18 = vector.broadcast %cst_14 : f32 to vector<100x128xf32>
    %c0_15 = arith.constant 0 : index
    %c0_16 = arith.constant 0 : index
    %19 = vector.load %arg12[%c0_15, %c0_16] : memref<100x128xf32, #tpu.memory_space<vmem>>, vector<100x128xf32>
    tpu.vector_store %arg12[%c0_15, %c0_16], %18 {strides = array<i32>} : memref<100x128xf32, #tpu.memory_space<vmem>>, vector<100x128xf32>,
    %20 = vector.extract_strided_slice %17 {offsets = [0, 0], sizes = [8, 128], strides = [1, 1]} : vector<64x128xf32> to vector<8x128xf32>
    %c11 = arith.constant 11 : index
    %c0_17 = arith.constant 0 : index
    %21 = vector.load %arg12[%c11, %c0_17] : memref<100x128xf32, #tpu.memory_space<vmem>>, vector<8x128xf32>
    tpu.vector_store %arg12[%c11, %c0_17], %20 {strides = array<i32>} : memref<100x128xf32, #tpu.memory_space<vmem>>, vector<8x128xf32>,
    %22 = vector.extract_strided_slice %17 {offsets = [8, 0], sizes = [8, 128], strides = [1, 1]} : vector<64x128xf32> to vector<8x128xf32>
    %c21 = arith.constant 21 : index
    %c0_18 = arith.constant 0 : index
    %23 = vector.load %arg12[%c21, %c0_18] : memref<100x128xf32, #tpu.memory_space<vmem>>, vector<8x128xf32>
    tpu.vector_store %arg12[%c21, %c0_18], %22 {strides = array<i32>} : memref<100x128xf32, #tpu.memory_space<vmem>>, vector<8x128xf32>,
    %24 = vector.extract_strided_slice %17 {offsets = [16, 0], sizes = [8, 128], strides = [1, 1]} : vector<64x128xf32> to vector<8x128xf32>
    %c31 = arith.constant 31 : index
    %c0_19 = arith.constant 0 : index
    %25 = vector.load %arg12[%c31, %c0_19] : memref<100x128xf32, #tpu.memory_space<vmem>>, vector<8x128xf32>
    tpu.vector_store %arg12[%c31, %c0_19], %24 {strides = array<i32>} : memref<100x128xf32, #tpu.memory_space<vmem>>, vector<8x128xf32>,
    %26 = vector.extract_strided_slice %17 {offsets = [24, 0], sizes = [8, 128], strides = [1, 1]} : vector<64x128xf32> to vector<8x128xf32>
    %c41 = arith.constant 41 : index
    %c0_20 = arith.constant 0 : index
    %27 = vector.load %arg12[%c41, %c0_20] : memref<100x128xf32, #tpu.memory_space<vmem>>, vector<8x128xf32>
    tpu.vector_store %arg12[%c41, %c0_20], %26 {strides = array<i32>} : memref<100x128xf32, #tpu.memory_space<vmem>>, vector<8x128xf32>,
    %28 = vector.extract_strided_slice %17 {offsets = [32, 0], sizes = [8, 128], strides = [1, 1]} : vector<64x128xf32> to vector<8x128xf32>
    %c51 = arith.constant 51 : index
    %c0_21 = arith.constant 0 : index
    %29 = vector.load %arg12[%c51, %c0_21] : memref<100x128xf32, #tpu.memory_space<vmem>>, vector<8x128xf32>
    tpu.vector_store %arg12[%c51, %c0_21], %28 {strides = array<i32>} : memref<100x128xf32, #tpu.memory_space<vmem>>, vector<8x128xf32>,
    %30 = vector.extract_strided_slice %17 {offsets = [40, 0], sizes = [8, 128], strides = [1, 1]} : vector<64x128xf32> to vector<8x128xf32>
    %c61 = arith.constant 61 : index
    %c0_22 = arith.constant 0 : index
    %31 = vector.load %arg12[%c61, %c0_22] : memref<100x128xf32, #tpu.memory_space<vmem>>, vector<8x128xf32>
    tpu.vector_store %arg12[%c61, %c0_22], %30 {strides = array<i32>} : memref<100x128xf32, #tpu.memory_space<vmem>>, vector<8x128xf32>,
    %32 = vector.extract_strided_slice %17 {offsets = [48, 0], sizes = [8, 128], strides = [1, 1]} : vector<64x128xf32> to vector<8x128xf32>
    %c71 = arith.constant 71 : index
    %c0_23 = arith.constant 0 : index
    %33 = vector.load %arg12[%c71, %c0_23] : memref<100x128xf32, #tpu.memory_space<vmem>>, vector<8x128xf32>
    tpu.vector_store %arg12[%c71, %c0_23], %32 {strides = array<i32>} : memref<100x128xf32, #tpu.memory_space<vmem>>, vector<8x128xf32>,
    %34 = vector.extract_strided_slice %17 {offsets = [56, 0], sizes = [8, 128], strides = [1, 1]} : vector<64x128xf32> to vector<8x128xf32>
    %c81 = arith.constant 81 : index
    %c0_24 = arith.constant 0 : index
    %35 = vector.load %arg12[%c81, %c0_24] : memref<100x128xf32, #tpu.memory_space<vmem>>, vector<8x128xf32>
    tpu.vector_store %arg12[%c81, %c0_24], %34 {strides = array<i32>} : memref<100x128xf32, #tpu.memory_space<vmem>>, vector<8x128xf32>,
    %c0_25 = arith.constant 0 : index
    %c0_26 = arith.constant 0 : index
    %36 = vector.load %arg4[%c0_25, %c0_26] : memref<9x128xf32, #tpu.memory_space<vmem>>, vector<1x128xf32>
    %c1_27 = arith.constant 1 : index
    %c0_28 = arith.constant 0 : index
    %37 = vector.load %arg4[%c1_27, %c0_28] : memref<9x128xf32, #tpu.memory_space<vmem>>, vector<1x128xf32>
    %c2 = arith.constant 2 : index
    %c0_29 = arith.constant 0 : index
    %38 = vector.load %arg4[%c2, %c0_29] : memref<9x128xf32, #tpu.memory_space<vmem>>, vector<1x128xf32>
    %c3 = arith.constant 3 : index
    %c0_30 = arith.constant 0 : index
    %39 = vector.load %arg4[%c3, %c0_30] : memref<9x128xf32, #tpu.memory_space<vmem>>, vector<1x128xf32>
    %c4 = arith.constant 4 : index
    %c0_31 = arith.constant 0 : index
    %40 = vector.load %arg4[%c4, %c0_31] : memref<9x128xf32, #tpu.memory_space<vmem>>, vector<1x128xf32>
    %c5 = arith.constant 5 : index
    %c0_32 = arith.constant 0 : index
    %41 = vector.load %arg4[%c5, %c0_32] : memref<9x128xf32, #tpu.memory_space<vmem>>, vector<1x128xf32>
    %c6 = arith.constant 6 : index
    %c0_33 = arith.constant 0 : index
    %42 = vector.load %arg4[%c6, %c0_33] : memref<9x128xf32, #tpu.memory_space<vmem>>, vector<1x128xf32>
    %c7 = arith.constant 7 : index
    %c0_34 = arith.constant 0 : index
    %43 = vector.load %arg4[%c7, %c0_34] : memref<9x128xf32, #tpu.memory_space<vmem>>, vector<1x128xf32>
    %c8 = arith.constant 8 : index
    %c0_35 = arith.constant 0 : index
    %44 = vector.load %arg4[%c8, %c0_35] : memref<9x128xf32, #tpu.memory_space<vmem>>, vector<1x128xf32>
    %c2_36 = arith.constant 2 : index
    %c0_37 = arith.constant 0 : index
    %45 = vector.load %arg8[%c2_36, %c0_37] : memref<8x128xf32, #tpu.memory_space<vmem>>, vector<1x128xf32>
    %cst_38 = arith.constant 0.000000e+00 : f32
    %46 = vector.broadcast %cst_38 : f32 to vector<8x128xf32>
    %c0_39 = arith.constant 0 : index
    %c0_40 = arith.constant 0 : index
    %47 = vector.load %arg12[%c0_39, %c0_40] : memref<100x128xf32, #tpu.memory_space<vmem>>, vector<8x128xf32>
    %48 = vector.broadcast %36 : vector<1x128xf32> to vector<8x128xf32>
    %49 = arith.mulf %47, %48 : vector<8x128xf32>
    %50 = arith.addf %46, %49 : vector<8x128xf32>
    %c1_41 = arith.constant 1 : index
    %c0_42 = arith.constant 0 : index
    %51 = vector.load %arg12[%c1_41, %c0_42] : memref<100x128xf32, #tpu.memory_space<vmem>>, vector<8x128xf32>
    %52 = vector.broadcast %37 : vector<1x128xf32> to vector<8x128xf32>
    %53 = arith.mulf %51, %52 : vector<8x128xf32>
    %54 = arith.addf %50, %53 : vector<8x128xf32>
    %c2_43 = arith.constant 2 : index
    %c0_44 = arith.constant 0 : index
    %55 = vector.load %arg12[%c2_43, %c0_44] : memref<100x128xf32, #tpu.memory_space<vmem>>, vector<8x128xf32>
    %56 = vector.broadcast %38 : vector<1x128xf32> to vector<8x128xf32>
    %57 = arith.mulf %55, %56 : vector<8x128xf32>
    %58 = arith.addf %54, %57 : vector<8x128xf32>
    %c10 = arith.constant 10 : index
    %c0_45 = arith.constant 0 : index
    %59 = vector.load %arg12[%c10, %c0_45] : memref<100x128xf32, #tpu.memory_space<vmem>>, vector<8x128xf32>
    %60 = vector.broadcast %39 : vector<1x128xf32> to vector<8x128xf32>
    %61 = arith.mulf %59, %60 : vector<8x128xf32>
    %62 = arith.addf %58, %61 : vector<8x128xf32>
    %c11_46 = arith.constant 11 : index
    %c0_47 = arith.constant 0 : index
    %63 = vector.load %arg12[%c11_46, %c0_47] : memref<100x128xf32, #tpu.memory_space<vmem>>, vector<8x128xf32>
    %64 = vector.broadcast %40 : vector<1x128xf32> to vector<8x128xf32>
    %65 = arith.mulf %63, %64 : vector<8x128xf32>
    %66 = arith.addf %62, %65 : vector<8x128xf32>
    %c12 = arith.constant 12 : index
    %c0_48 = arith.constant 0 : index
    %67 = vector.load %arg12[%c12, %c0_48] : memref<100x128xf32, #tpu.memory_space<vmem>>, vector<8x128xf32>
    %68 = vector.broadcast %41 : vector<1x128xf32> to vector<8x128xf32>
    %69 = arith.mulf %67, %68 : vector<8x128xf32>
    %70 = arith.addf %66, %69 : vector<8x128xf32>
    %c20 = arith.constant 20 : index
    %c0_49 = arith.constant 0 : index
    %71 = vector.load %arg12[%c20, %c0_49] : memref<100x128xf32, #tpu.memory_space<vmem>>, vector<8x128xf32>
    %72 = vector.broadcast %42 : vector<1x128xf32> to vector<8x128xf32>
    %73 = arith.mulf %71, %72 : vector<8x128xf32>
    %74 = arith.addf %70, %73 : vector<8x128xf32>
    %c21_50 = arith.constant 21 : index
    %c0_51 = arith.constant 0 : index
    %75 = vector.load %arg12[%c21_50, %c0_51] : memref<100x128xf32, #tpu.memory_space<vmem>>, vector<8x128xf32>
    %76 = vector.broadcast %43 : vector<1x128xf32> to vector<8x128xf32>
    %77 = arith.mulf %75, %76 : vector<8x128xf32>
    %78 = arith.addf %74, %77 : vector<8x128xf32>
    %c22 = arith.constant 22 : index
    %c0_52 = arith.constant 0 : index
    %79 = vector.load %arg12[%c22, %c0_52] : memref<100x128xf32, #tpu.memory_space<vmem>>, vector<8x128xf32>
    %80 = vector.broadcast %44 : vector<1x128xf32> to vector<8x128xf32>
    %81 = arith.mulf %79, %80 : vector<8x128xf32>
    %82 = arith.addf %78, %81 : vector<8x128xf32>
    %83 = vector.broadcast %45 : vector<1x128xf32> to vector<8x128xf32>
    %84 = arith.addf %82, %83 : vector<8x128xf32>
    %cst_53 = arith.constant 0.000000e+00 : f32
    %cst_54 = arith.constant 6.000000e+00 : f32
    %85 = vector.broadcast %cst_53 : f32 to vector<8x128xf32>
    %86 = arith.maximumf %85, %84 : vector<8x128xf32>
    %87 = vector.broadcast %cst_54 : f32 to vector<8x128xf32>
    %88 = arith.minimumf %87, %86 : vector<8x128xf32>
    %c0_55 = arith.constant 0 : index
    %c0_56 = arith.constant 0 : index
    %89 = vector.load %arg13[%c0_55, %c0_56] : memref<64x128xf32, #tpu.memory_space<vmem>>, vector<8x128xf32>
    tpu.vector_store %arg13[%c0_55, %c0_56], %88 {strides = array<i32>} : memref<64x128xf32, #tpu.memory_space<vmem>>, vector<8x128xf32>,
    %cst_57 = arith.constant 0.000000e+00 : f32
    %90 = vector.broadcast %cst_57 : f32 to vector<8x128xf32>
    %c10_58 = arith.constant 10 : index
    %c0_59 = arith.constant 0 : index
    %91 = vector.load %arg12[%c10_58, %c0_59] : memref<100x128xf32, #tpu.memory_space<vmem>>, vector<8x128xf32>
    %92 = vector.broadcast %36 : vector<1x128xf32> to vector<8x128xf32>
    %93 = arith.mulf %91, %92 : vector<8x128xf32>
    %94 = arith.addf %90, %93 : vector<8x128xf32>
    %c11_60 = arith.constant 11 : index
    %c0_61 = arith.constant 0 : index
    %95 = vector.load %arg12[%c11_60, %c0_61] : memref<100x128xf32, #tpu.memory_space<vmem>>, vector<8x128xf32>
    %96 = vector.broadcast %37 : vector<1x128xf32> to vector<8x128xf32>
    %97 = arith.mulf %95, %96 : vector<8x128xf32>
    %98 = arith.addf %94, %97 : vector<8x128xf32>
    %c12_62 = arith.constant 12 : index
    %c0_63 = arith.constant 0 : index
    %99 = vector.load %arg12[%c12_62, %c0_63] : memref<100x128xf32, #tpu.memory_space<vmem>>, vector<8x128xf32>
    %100 = vector.broadcast %38 : vector<1x128xf32> to vector<8x128xf32>
    %101 = arith.mulf %99, %100 : vector<8x128xf32>
    %102 = arith.addf %98, %101 : vector<8x128xf32>
    %c20_64 = arith.constant 20 : index
    %c0_65 = arith.constant 0 : index
    %103 = vector.load %arg12[%c20_64, %c0_65] : memref<100x128xf32, #tpu.memory_space<vmem>>, vector<8x128xf32>
    %104 = vector.broadcast %39 : vector<1x128xf32> to vector<8x128xf32>
    %105 = arith.mulf %103, %104 : vector<8x128xf32>
    %106 = arith.addf %102, %105 : vector<8x128xf32>
    %c21_66 = arith.constant 21 : index
    %c0_67 = arith.constant 0 : index
    %107 = vector.load %arg12[%c21_66, %c0_67] : memref<100x128xf32, #tpu.memory_space<vmem>>, vector<8x128xf32>
    %108 = vector.broadcast %40 : vector<1x128xf32> to vector<8x128xf32>
    %109 = arith.mulf %107, %108 : vector<8x128xf32>
    %110 = arith.addf %106, %109 : vector<8x128xf32>
    %c22_68 = arith.constant 22 : index
    %c0_69 = arith.constant 0 : index
    %111 = vector.load %arg12[%c22_68, %c0_69] : memref<100x128xf32, #tpu.memory_space<vmem>>, vector<8x128xf32>
    %112 = vector.broadcast %41 : vector<1x128xf32> to vector<8x128xf32>
    %113 = arith.mulf %111, %112 : vector<8x128xf32>
    %114 = arith.addf %110, %113 : vector<8x128xf32>
    %c30 = arith.constant 30 : index
    %c0_70 = arith.constant 0 : index
    %115 = vector.load %arg12[%c30, %c0_70] : memref<100x128xf32, #tpu.memory_space<vmem>>, vector<8x128xf32>
    %116 = vector.broadcast %42 : vector<1x128xf32> to vector<8x128xf32>
    %117 = arith.mulf %115, %116 : vector<8x128xf32>
    %118 = arith.addf %114, %117 : vector<8x128xf32>
    %c31_71 = arith.constant 31 : index
    %c0_72 = arith.constant 0 : index
    %119 = vector.load %arg12[%c31_71, %c0_72] : memref<100x128xf32, #tpu.memory_space<vmem>>, vector<8x128xf32>
    %120 = vector.broadcast %43 : vector<1x128xf32> to vector<8x128xf32>
    %121 = arith.mulf %119, %120 : vector<8x128xf32>
    %122 = arith.addf %118, %121 : vector<8x128xf32>
    %c32 = arith.constant 32 : index
    %c0_73 = arith.constant 0 : index
    %123 = vector.load %arg12[%c32, %c0_73] : memref<100x128xf32, #tpu.memory_space<vmem>>, vector<8x128xf32>
    %124 = vector.broadcast %44 : vector<1x128xf32> to vector<8x128xf32>
    %125 = arith.mulf %123, %124 : vector<8x128xf32>
    %126 = arith.addf %122, %125 : vector<8x128xf32>
    %127 = vector.broadcast %45 : vector<1x128xf32> to vector<8x128xf32>
    %128 = arith.addf %126, %127 : vector<8x128xf32>
    %cst_74 = arith.constant 0.000000e+00 : f32
    %cst_75 = arith.constant 6.000000e+00 : f32
    %129 = vector.broadcast %cst_74 : f32 to vector<8x128xf32>
    %130 = arith.maximumf %129, %128 : vector<8x128xf32>
    %131 = vector.broadcast %cst_75 : f32 to vector<8x128xf32>
    %132 = arith.minimumf %131, %130 : vector<8x128xf32>
    %c8_76 = arith.constant 8 : index
    %c0_77 = arith.constant 0 : index
    %133 = vector.load %arg13[%c8_76, %c0_77] : memref<64x128xf32, #tpu.memory_space<vmem>>, vector<8x128xf32>
    tpu.vector_store %arg13[%c8_76, %c0_77], %132 {strides = array<i32>} : memref<64x128xf32, #tpu.memory_space<vmem>>, vector<8x128xf32>,
    %cst_78 = arith.constant 0.000000e+00 : f32
    %134 = vector.broadcast %cst_78 : f32 to vector<8x128xf32>
    %c20_79 = arith.constant 20 : index
    %c0_80 = arith.constant 0 : index
    %135 = vector.load %arg12[%c20_79, %c0_80] : memref<100x128xf32, #tpu.memory_space<vmem>>, vector<8x128xf32>
    %136 = vector.broadcast %36 : vector<1x128xf32> to vector<8x128xf32>
    %137 = arith.mulf %135, %136 : vector<8x128xf32>
    %138 = arith.addf %134, %137 : vector<8x128xf32>
    %c21_81 = arith.constant 21 : index
    %c0_82 = arith.constant 0 : index
    %139 = vector.load %arg12[%c21_81, %c0_82] : memref<100x128xf32, #tpu.memory_space<vmem>>, vector<8x128xf32>
    %140 = vector.broadcast %37 : vector<1x128xf32> to vector<8x128xf32>
    %141 = arith.mulf %139, %140 : vector<8x128xf32>
    %142 = arith.addf %138, %141 : vector<8x128xf32>
    %c22_83 = arith.constant 22 : index
    %c0_84 = arith.constant 0 : index
    %143 = vector.load %arg12[%c22_83, %c0_84] : memref<100x128xf32, #tpu.memory_space<vmem>>, vector<8x128xf32>
    %144 = vector.broadcast %38 : vector<1x128xf32> to vector<8x128xf32>
    %145 = arith.mulf %143, %144 : vector<8x128xf32>
    %146 = arith.addf %142, %145 : vector<8x128xf32>
    %c30_85 = arith.constant 30 : index
    %c0_86 = arith.constant 0 : index
    %147 = vector.load %arg12[%c30_85, %c0_86] : memref<100x128xf32, #tpu.memory_space<vmem>>, vector<8x128xf32>
    %148 = vector.broadcast %39 : vector<1x128xf32> to vector<8x128xf32>
    %149 = arith.mulf %147, %148 : vector<8x128xf32>
    %150 = arith.addf %146, %149 : vector<8x128xf32>
    %c31_87 = arith.constant 31 : index
    %c0_88 = arith.constant 0 : index
    %151 = vector.load %arg12[%c31_87, %c0_88] : memref<100x128xf32, #tpu.memory_space<vmem>>, vector<8x128xf32>
    %152 = vector.broadcast %40 : vector<1x128xf32> to vector<8x128xf32>
    %153 = arith.mulf %151, %152 : vector<8x128xf32>
    %154 = arith.addf %150, %153 : vector<8x128xf32>
    %c32_89 = arith.constant 32 : index
    %c0_90 = arith.constant 0 : index
    %155 = vector.load %arg12[%c32_89, %c0_90] : memref<100x128xf32, #tpu.memory_space<vmem>>, vector<8x128xf32>
    %156 = vector.broadcast %41 : vector<1x128xf32> to vector<8x128xf32>
    %157 = arith.mulf %155, %156 : vector<8x128xf32>
    %158 = arith.addf %154, %157 : vector<8x128xf32>
    %c40 = arith.constant 40 : index
    %c0_91 = arith.constant 0 : index
    %159 = vector.load %arg12[%c40, %c0_91] : memref<100x128xf32, #tpu.memory_space<vmem>>, vector<8x128xf32>
    %160 = vector.broadcast %42 : vector<1x128xf32> to vector<8x128xf32>
    %161 = arith.mulf %159, %160 : vector<8x128xf32>
    %162 = arith.addf %158, %161 : vector<8x128xf32>
    %c41_92 = arith.constant 41 : index
    %c0_93 = arith.constant 0 : index
    %163 = vector.load %arg12[%c41_92, %c0_93] : memref<100x128xf32, #tpu.memory_space<vmem>>, vector<8x128xf32>
    %164 = vector.broadcast %43 : vector<1x128xf32> to vector<8x128xf32>
    %165 = arith.mulf %163, %164 : vector<8x128xf32>
    %166 = arith.addf %162, %165 : vector<8x128xf32>
    %c42 = arith.constant 42 : index
    %c0_94 = arith.constant 0 : index
    %167 = vector.load %arg12[%c42, %c0_94] : memref<100x128xf32, #tpu.memory_space<vmem>>, vector<8x128xf32>
    %168 = vector.broadcast %44 : vector<1x128xf32> to vector<8x128xf32>
    %169 = arith.mulf %167, %168 : vector<8x128xf32>
    %170 = arith.addf %166, %169 : vector<8x128xf32>
    %171 = vector.broadcast %45 : vector<1x128xf32> to vector<8x128xf32>
    %172 = arith.addf %170, %171 : vector<8x128xf32>
    %cst_95 = arith.constant 0.000000e+00 : f32
    %cst_96 = arith.constant 6.000000e+00 : f32
    %173 = vector.broadcast %cst_95 : f32 to vector<8x128xf32>
    %174 = arith.maximumf %173, %172 : vector<8x128xf32>
    %175 = vector.broadcast %cst_96 : f32 to vector<8x128xf32>
    %176 = arith.minimumf %175, %174 : vector<8x128xf32>
    %c16 = arith.constant 16 : index
    %c0_97 = arith.constant 0 : index
    %177 = vector.load %arg13[%c16, %c0_97] : memref<64x128xf32, #tpu.memory_space<vmem>>, vector<8x128xf32>
    tpu.vector_store %arg13[%c16, %c0_97], %176 {strides = array<i32>} : memref<64x128xf32, #tpu.memory_space<vmem>>, vector<8x128xf32>,
    %cst_98 = arith.constant 0.000000e+00 : f32
    %178 = vector.broadcast %cst_98 : f32 to vector<8x128xf32>
    %c30_99 = arith.constant 30 : index
    %c0_100 = arith.constant 0 : index
    %179 = vector.load %arg12[%c30_99, %c0_100] : memref<100x128xf32, #tpu.memory_space<vmem>>, vector<8x128xf32>
    %180 = vector.broadcast %36 : vector<1x128xf32> to vector<8x128xf32>
    %181 = arith.mulf %179, %180 : vector<8x128xf32>
    %182 = arith.addf %178, %181 : vector<8x128xf32>
    %c31_101 = arith.constant 31 : index
    %c0_102 = arith.constant 0 : index
    %183 = vector.load %arg12[%c31_101, %c0_102] : memref<100x128xf32, #tpu.memory_space<vmem>>, vector<8x128xf32>
    %184 = vector.broadcast %37 : vector<1x128xf32> to vector<8x128xf32>
    %185 = arith.mulf %183, %184 : vector<8x128xf32>
    %186 = arith.addf %182, %185 : vector<8x128xf32>
    %c32_103 = arith.constant 32 : index
    %c0_104 = arith.constant 0 : index
    %187 = vector.load %arg12[%c32_103, %c0_104] : memref<100x128xf32, #tpu.memory_space<vmem>>, vector<8x128xf32>
    %188 = vector.broadcast %38 : vector<1x128xf32> to vector<8x128xf32>
    %189 = arith.mulf %187, %188 : vector<8x128xf32>
    %190 = arith.addf %186, %189 : vector<8x128xf32>
    %c40_105 = arith.constant 40 : index
    %c0_106 = arith.constant 0 : index
    %191 = vector.load %arg12[%c40_105, %c0_106] : memref<100x128xf32, #tpu.memory_space<vmem>>, vector<8x128xf32>
    %192 = vector.broadcast %39 : vector<1x128xf32> to vector<8x128xf32>
    %193 = arith.mulf %191, %192 : vector<8x128xf32>
    %194 = arith.addf %190, %193 : vector<8x128xf32>
    %c41_107 = arith.constant 41 : index
    %c0_108 = arith.constant 0 : index
    %195 = vector.load %arg12[%c41_107, %c0_108] : memref<100x128xf32, #tpu.memory_space<vmem>>, vector<8x128xf32>
    %196 = vector.broadcast %40 : vector<1x128xf32> to vector<8x128xf32>
    %197 = arith.mulf %195, %196 : vector<8x128xf32>
    %198 = arith.addf %194, %197 : vector<8x128xf32>
    %c42_109 = arith.constant 42 : index
    %c0_110 = arith.constant 0 : index
    %199 = vector.load %arg12[%c42_109, %c0_110] : memref<100x128xf32, #tpu.memory_space<vmem>>, vector<8x128xf32>
    %200 = vector.broadcast %41 : vector<1x128xf32> to vector<8x128xf32>
    %201 = arith.mulf %199, %200 : vector<8x128xf32>
    %202 = arith.addf %198, %201 : vector<8x128xf32>
    %c50 = arith.constant 50 : index
    %c0_111 = arith.constant 0 : index
    %203 = vector.load %arg12[%c50, %c0_111] : memref<100x128xf32, #tpu.memory_space<vmem>>, vector<8x128xf32>
    %204 = vector.broadcast %42 : vector<1x128xf32> to vector<8x128xf32>
    %205 = arith.mulf %203, %204 : vector<8x128xf32>
    %206 = arith.addf %202, %205 : vector<8x128xf32>
    %c51_112 = arith.constant 51 : index
    %c0_113 = arith.constant 0 : index
    %207 = vector.load %arg12[%c51_112, %c0_113] : memref<100x128xf32, #tpu.memory_space<vmem>>, vector<8x128xf32>
    %208 = vector.broadcast %43 : vector<1x128xf32> to vector<8x128xf32>
    %209 = arith.mulf %207, %208 : vector<8x128xf32>
    %210 = arith.addf %206, %209 : vector<8x128xf32>
    %c52 = arith.constant 52 : index
    %c0_114 = arith.constant 0 : index
    %211 = vector.load %arg12[%c52, %c0_114] : memref<100x128xf32, #tpu.memory_space<vmem>>, vector<8x128xf32>
    %212 = vector.broadcast %44 : vector<1x128xf32> to vector<8x128xf32>
    %213 = arith.mulf %211, %212 : vector<8x128xf32>
    %214 = arith.addf %210, %213 : vector<8x128xf32>
    %215 = vector.broadcast %45 : vector<1x128xf32> to vector<8x128xf32>
    %216 = arith.addf %214, %215 : vector<8x128xf32>
    %cst_115 = arith.constant 0.000000e+00 : f32
    %cst_116 = arith.constant 6.000000e+00 : f32
    %217 = vector.broadcast %cst_115 : f32 to vector<8x128xf32>
    %218 = arith.maximumf %217, %216 : vector<8x128xf32>
    %219 = vector.broadcast %cst_116 : f32 to vector<8x128xf32>
    %220 = arith.minimumf %219, %218 : vector<8x128xf32>
    %c24 = arith.constant 24 : index
    %c0_117 = arith.constant 0 : index
    %221 = vector.load %arg13[%c24, %c0_117] : memref<64x128xf32, #tpu.memory_space<vmem>>, vector<8x128xf32>
    tpu.vector_store %arg13[%c24, %c0_117], %220 {strides = array<i32>} : memref<64x128xf32, #tpu.memory_space<vmem>>, vector<8x128xf32>,
    %cst_118 = arith.constant 0.000000e+00 : f32
    %222 = vector.broadcast %cst_118 : f32 to vector<8x128xf32>
    %c40_119 = arith.constant 40 : index
    %c0_120 = arith.constant 0 : index
    %223 = vector.load %arg12[%c40_119, %c0_120] : memref<100x128xf32, #tpu.memory_space<vmem>>, vector<8x128xf32>
    %224 = vector.broadcast %36 : vector<1x128xf32> to vector<8x128xf32>
    %225 = arith.mulf %223, %224 : vector<8x128xf32>
    %226 = arith.addf %222, %225 : vector<8x128xf32>
    %c41_121 = arith.constant 41 : index
    %c0_122 = arith.constant 0 : index
    %227 = vector.load %arg12[%c41_121, %c0_122] : memref<100x128xf32, #tpu.memory_space<vmem>>, vector<8x128xf32>
    %228 = vector.broadcast %37 : vector<1x128xf32> to vector<8x128xf32>
    %229 = arith.mulf %227, %228 : vector<8x128xf32>
    %230 = arith.addf %226, %229 : vector<8x128xf32>
    %c42_123 = arith.constant 42 : index
    %c0_124 = arith.constant 0 : index
    %231 = vector.load %arg12[%c42_123, %c0_124] : memref<100x128xf32, #tpu.memory_space<vmem>>, vector<8x128xf32>
    %232 = vector.broadcast %38 : vector<1x128xf32> to vector<8x128xf32>
    %233 = arith.mulf %231, %232 : vector<8x128xf32>
    %234 = arith.addf %230, %233 : vector<8x128xf32>
    %c50_125 = arith.constant 50 : index
    %c0_126 = arith.constant 0 : index
    %235 = vector.load %arg12[%c50_125, %c0_126] : memref<100x128xf32, #tpu.memory_space<vmem>>, vector<8x128xf32>
    %236 = vector.broadcast %39 : vector<1x128xf32> to vector<8x128xf32>
    %237 = arith.mulf %235, %236 : vector<8x128xf32>
    %238 = arith.addf %234, %237 : vector<8x128xf32>
    %c51_127 = arith.constant 51 : index
    %c0_128 = arith.constant 0 : index
    %239 = vector.load %arg12[%c51_127, %c0_128] : memref<100x128xf32, #tpu.memory_space<vmem>>, vector<8x128xf32>
    %240 = vector.broadcast %40 : vector<1x128xf32> to vector<8x128xf32>
    %241 = arith.mulf %239, %240 : vector<8x128xf32>
    %242 = arith.addf %238, %241 : vector<8x128xf32>
    %c52_129 = arith.constant 52 : index
    %c0_130 = arith.constant 0 : index
    %243 = vector.load %arg12[%c52_129, %c0_130] : memref<100x128xf32, #tpu.memory_space<vmem>>, vector<8x128xf32>
    %244 = vector.broadcast %41 : vector<1x128xf32> to vector<8x128xf32>
    %245 = arith.mulf %243, %244 : vector<8x128xf32>
    %246 = arith.addf %242, %245 : vector<8x128xf32>
    %c60 = arith.constant 60 : index
    %c0_131 = arith.constant 0 : index
    %247 = vector.load %arg12[%c60, %c0_131] : memref<100x128xf32, #tpu.memory_space<vmem>>, vector<8x128xf32>
    %248 = vector.broadcast %42 : vector<1x128xf32> to vector<8x128xf32>
    %249 = arith.mulf %247, %248 : vector<8x128xf32>
    %250 = arith.addf %246, %249 : vector<8x128xf32>
    %c61_132 = arith.constant 61 : index
    %c0_133 = arith.constant 0 : index
    %251 = vector.load %arg12[%c61_132, %c0_133] : memref<100x128xf32, #tpu.memory_space<vmem>>, vector<8x128xf32>
    %252 = vector.broadcast %43 : vector<1x128xf32> to vector<8x128xf32>
    %253 = arith.mulf %251, %252 : vector<8x128xf32>
    %254 = arith.addf %250, %253 : vector<8x128xf32>
    %c62 = arith.constant 62 : index
    %c0_134 = arith.constant 0 : index
    %255 = vector.load %arg12[%c62, %c0_134] : memref<100x128xf32, #tpu.memory_space<vmem>>, vector<8x128xf32>
    %256 = vector.broadcast %44 : vector<1x128xf32> to vector<8x128xf32>
    %257 = arith.mulf %255, %256 : vector<8x128xf32>
    %258 = arith.addf %254, %257 : vector<8x128xf32>
    %259 = vector.broadcast %45 : vector<1x128xf32> to vector<8x128xf32>
    %260 = arith.addf %258, %259 : vector<8x128xf32>
    %cst_135 = arith.constant 0.000000e+00 : f32
    %cst_136 = arith.constant 6.000000e+00 : f32
    %261 = vector.broadcast %cst_135 : f32 to vector<8x128xf32>
    %262 = arith.maximumf %261, %260 : vector<8x128xf32>
    %263 = vector.broadcast %cst_136 : f32 to vector<8x128xf32>
    %264 = arith.minimumf %263, %262 : vector<8x128xf32>
    %c32_137 = arith.constant 32 : index
    %c0_138 = arith.constant 0 : index
    %265 = vector.load %arg13[%c32_137, %c0_138] : memref<64x128xf32, #tpu.memory_space<vmem>>, vector<8x128xf32>
    tpu.vector_store %arg13[%c32_137, %c0_138], %264 {strides = array<i32>} : memref<64x128xf32, #tpu.memory_space<vmem>>, vector<8x128xf32>,
    %cst_139 = arith.constant 0.000000e+00 : f32
    %266 = vector.broadcast %cst_139 : f32 to vector<8x128xf32>
    %c50_140 = arith.constant 50 : index
    %c0_141 = arith.constant 0 : index
    %267 = vector.load %arg12[%c50_140, %c0_141] : memref<100x128xf32, #tpu.memory_space<vmem>>, vector<8x128xf32>
    %268 = vector.broadcast %36 : vector<1x128xf32> to vector<8x128xf32>
    %269 = arith.mulf %267, %268 : vector<8x128xf32>
    %270 = arith.addf %266, %269 : vector<8x128xf32>
    %c51_142 = arith.constant 51 : index
    %c0_143 = arith.constant 0 : index
    %271 = vector.load %arg12[%c51_142, %c0_143] : memref<100x128xf32, #tpu.memory_space<vmem>>, vector<8x128xf32>
    %272 = vector.broadcast %37 : vector<1x128xf32> to vector<8x128xf32>
    %273 = arith.mulf %271, %272 : vector<8x128xf32>
    %274 = arith.addf %270, %273 : vector<8x128xf32>
    %c52_144 = arith.constant 52 : index
    %c0_145 = arith.constant 0 : index
    %275 = vector.load %arg12[%c52_144, %c0_145] : memref<100x128xf32, #tpu.memory_space<vmem>>, vector<8x128xf32>
    %276 = vector.broadcast %38 : vector<1x128xf32> to vector<8x128xf32>
    %277 = arith.mulf %275, %276 : vector<8x128xf32>
    %278 = arith.addf %274, %277 : vector<8x128xf32>
    %c60_146 = arith.constant 60 : index
    %c0_147 = arith.constant 0 : index
    %279 = vector.load %arg12[%c60_146, %c0_147] : memref<100x128xf32, #tpu.memory_space<vmem>>, vector<8x128xf32>
    %280 = vector.broadcast %39 : vector<1x128xf32> to vector<8x128xf32>
    %281 = arith.mulf %279, %280 : vector<8x128xf32>
    %282 = arith.addf %278, %281 : vector<8x128xf32>
    %c61_148 = arith.constant 61 : index
    %c0_149 = arith.constant 0 : index
    %283 = vector.load %arg12[%c61_148, %c0_149] : memref<100x128xf32, #tpu.memory_space<vmem>>, vector<8x128xf32>
    %284 = vector.broadcast %40 : vector<1x128xf32> to vector<8x128xf32>
    %285 = arith.mulf %283, %284 : vector<8x128xf32>
    %286 = arith.addf %282, %285 : vector<8x128xf32>
    %c62_150 = arith.constant 62 : index
    %c0_151 = arith.constant 0 : index
    %287 = vector.load %arg12[%c62_150, %c0_151] : memref<100x128xf32, #tpu.memory_space<vmem>>, vector<8x128xf32>
    %288 = vector.broadcast %41 : vector<1x128xf32> to vector<8x128xf32>
    %289 = arith.mulf %287, %288 : vector<8x128xf32>
    %290 = arith.addf %286, %289 : vector<8x128xf32>
    %c70 = arith.constant 70 : index
    %c0_152 = arith.constant 0 : index
    %291 = vector.load %arg12[%c70, %c0_152] : memref<100x128xf32, #tpu.memory_space<vmem>>, vector<8x128xf32>
    %292 = vector.broadcast %42 : vector<1x128xf32> to vector<8x128xf32>
    %293 = arith.mulf %291, %292 : vector<8x128xf32>
    %294 = arith.addf %290, %293 : vector<8x128xf32>
    %c71_153 = arith.constant 71 : index
    %c0_154 = arith.constant 0 : index
    %295 = vector.load %arg12[%c71_153, %c0_154] : memref<100x128xf32, #tpu.memory_space<vmem>>, vector<8x128xf32>
    %296 = vector.broadcast %43 : vector<1x128xf32> to vector<8x128xf32>
    %297 = arith.mulf %295, %296 : vector<8x128xf32>
    %298 = arith.addf %294, %297 : vector<8x128xf32>
    %c72 = arith.constant 72 : index
    %c0_155 = arith.constant 0 : index
    %299 = vector.load %arg12[%c72, %c0_155] : memref<100x128xf32, #tpu.memory_space<vmem>>, vector<8x128xf32>
    %300 = vector.broadcast %44 : vector<1x128xf32> to vector<8x128xf32>
    %301 = arith.mulf %299, %300 : vector<8x128xf32>
    %302 = arith.addf %298, %301 : vector<8x128xf32>
    %303 = vector.broadcast %45 : vector<1x128xf32> to vector<8x128xf32>
    %304 = arith.addf %302, %303 : vector<8x128xf32>
    %cst_156 = arith.constant 0.000000e+00 : f32
    %cst_157 = arith.constant 6.000000e+00 : f32
    %305 = vector.broadcast %cst_156 : f32 to vector<8x128xf32>
    %306 = arith.maximumf %305, %304 : vector<8x128xf32>
    %307 = vector.broadcast %cst_157 : f32 to vector<8x128xf32>
    %308 = arith.minimumf %307, %306 : vector<8x128xf32>
    %c40_158 = arith.constant 40 : index
    %c0_159 = arith.constant 0 : index
    %309 = vector.load %arg13[%c40_158, %c0_159] : memref<64x128xf32, #tpu.memory_space<vmem>>, vector<8x128xf32>
    tpu.vector_store %arg13[%c40_158, %c0_159], %308 {strides = array<i32>} : memref<64x128xf32, #tpu.memory_space<vmem>>, vector<8x128xf32>,
    %cst_160 = arith.constant 0.000000e+00 : f32
    %310 = vector.broadcast %cst_160 : f32 to vector<8x128xf32>
    %c60_161 = arith.constant 60 : index
    %c0_162 = arith.constant 0 : index
    %311 = vector.load %arg12[%c60_161, %c0_162] : memref<100x128xf32, #tpu.memory_space<vmem>>, vector<8x128xf32>
    %312 = vector.broadcast %36 : vector<1x128xf32> to vector<8x128xf32>
    %313 = arith.mulf %311, %312 : vector<8x128xf32>
    %314 = arith.addf %310, %313 : vector<8x128xf32>
    %c61_163 = arith.constant 61 : index
    %c0_164 = arith.constant 0 : index
    %315 = vector.load %arg12[%c61_163, %c0_164] : memref<100x128xf32, #tpu.memory_space<vmem>>, vector<8x128xf32>
    %316 = vector.broadcast %37 : vector<1x128xf32> to vector<8x128xf32>
    %317 = arith.mulf %315, %316 : vector<8x128xf32>
    %318 = arith.addf %314, %317 : vector<8x128xf32>
    %c62_165 = arith.constant 62 : index
    %c0_166 = arith.constant 0 : index
    %319 = vector.load %arg12[%c62_165, %c0_166] : memref<100x128xf32, #tpu.memory_space<vmem>>, vector<8x128xf32>
    %320 = vector.broadcast %38 : vector<1x128xf32> to vector<8x128xf32>
    %321 = arith.mulf %319, %320 : vector<8x128xf32>
    %322 = arith.addf %318, %321 : vector<8x128xf32>
    %c70_167 = arith.constant 70 : index
    %c0_168 = arith.constant 0 : index
    %323 = vector.load %arg12[%c70_167, %c0_168] : memref<100x128xf32, #tpu.memory_space<vmem>>, vector<8x128xf32>
    %324 = vector.broadcast %39 : vector<1x128xf32> to vector<8x128xf32>
    %325 = arith.mulf %323, %324 : vector<8x128xf32>
    %326 = arith.addf %322, %325 : vector<8x128xf32>
    %c71_169 = arith.constant 71 : index
    %c0_170 = arith.constant 0 : index
    %327 = vector.load %arg12[%c71_169, %c0_170] : memref<100x128xf32, #tpu.memory_space<vmem>>, vector<8x128xf32>
    %328 = vector.broadcast %40 : vector<1x128xf32> to vector<8x128xf32>
    %329 = arith.mulf %327, %328 : vector<8x128xf32>
    %330 = arith.addf %326, %329 : vector<8x128xf32>
    %c72_171 = arith.constant 72 : index
    %c0_172 = arith.constant 0 : index
    %331 = vector.load %arg12[%c72_171, %c0_172] : memref<100x128xf32, #tpu.memory_space<vmem>>, vector<8x128xf32>
    %332 = vector.broadcast %41 : vector<1x128xf32> to vector<8x128xf32>
    %333 = arith.mulf %331, %332 : vector<8x128xf32>
    %334 = arith.addf %330, %333 : vector<8x128xf32>
    %c80 = arith.constant 80 : index
    %c0_173 = arith.constant 0 : index
    %335 = vector.load %arg12[%c80, %c0_173] : memref<100x128xf32, #tpu.memory_space<vmem>>, vector<8x128xf32>
    %336 = vector.broadcast %42 : vector<1x128xf32> to vector<8x128xf32>
    %337 = arith.mulf %335, %336 : vector<8x128xf32>
    %338 = arith.addf %334, %337 : vector<8x128xf32>
    %c81_174 = arith.constant 81 : index
    %c0_175 = arith.constant 0 : index
    %339 = vector.load %arg12[%c81_174, %c0_175] : memref<100x128xf32, #tpu.memory_space<vmem>>, vector<8x128xf32>
    %340 = vector.broadcast %43 : vector<1x128xf32> to vector<8x128xf32>
    %341 = arith.mulf %339, %340 : vector<8x128xf32>
    %342 = arith.addf %338, %341 : vector<8x128xf32>
    %c82 = arith.constant 82 : index
    %c0_176 = arith.constant 0 : index
    %343 = vector.load %arg12[%c82, %c0_176] : memref<100x128xf32, #tpu.memory_space<vmem>>, vector<8x128xf32>
    %344 = vector.broadcast %44 : vector<1x128xf32> to vector<8x128xf32>
    %345 = arith.mulf %343, %344 : vector<8x128xf32>
    %346 = arith.addf %342, %345 : vector<8x128xf32>
    %347 = vector.broadcast %45 : vector<1x128xf32> to vector<8x128xf32>
    %348 = arith.addf %346, %347 : vector<8x128xf32>
    %cst_177 = arith.constant 0.000000e+00 : f32
    %cst_178 = arith.constant 6.000000e+00 : f32
    %349 = vector.broadcast %cst_177 : f32 to vector<8x128xf32>
    %350 = arith.maximumf %349, %348 : vector<8x128xf32>
    %351 = vector.broadcast %cst_178 : f32 to vector<8x128xf32>
    %352 = arith.minimumf %351, %350 : vector<8x128xf32>
    %c48 = arith.constant 48 : index
    %c0_179 = arith.constant 0 : index
    %353 = vector.load %arg13[%c48, %c0_179] : memref<64x128xf32, #tpu.memory_space<vmem>>, vector<8x128xf32>
    tpu.vector_store %arg13[%c48, %c0_179], %352 {strides = array<i32>} : memref<64x128xf32, #tpu.memory_space<vmem>>, vector<8x128xf32>,
    %cst_180 = arith.constant 0.000000e+00 : f32
    %354 = vector.broadcast %cst_180 : f32 to vector<8x128xf32>
    %c70_181 = arith.constant 70 : index
    %c0_182 = arith.constant 0 : index
    %355 = vector.load %arg12[%c70_181, %c0_182] : memref<100x128xf32, #tpu.memory_space<vmem>>, vector<8x128xf32>
    %356 = vector.broadcast %36 : vector<1x128xf32> to vector<8x128xf32>
    %357 = arith.mulf %355, %356 : vector<8x128xf32>
    %358 = arith.addf %354, %357 : vector<8x128xf32>
    %c71_183 = arith.constant 71 : index
    %c0_184 = arith.constant 0 : index
    %359 = vector.load %arg12[%c71_183, %c0_184] : memref<100x128xf32, #tpu.memory_space<vmem>>, vector<8x128xf32>
    %360 = vector.broadcast %37 : vector<1x128xf32> to vector<8x128xf32>
    %361 = arith.mulf %359, %360 : vector<8x128xf32>
    %362 = arith.addf %358, %361 : vector<8x128xf32>
    %c72_185 = arith.constant 72 : index
    %c0_186 = arith.constant 0 : index
    %363 = vector.load %arg12[%c72_185, %c0_186] : memref<100x128xf32, #tpu.memory_space<vmem>>, vector<8x128xf32>
    %364 = vector.broadcast %38 : vector<1x128xf32> to vector<8x128xf32>
    %365 = arith.mulf %363, %364 : vector<8x128xf32>
    %366 = arith.addf %362, %365 : vector<8x128xf32>
    %c80_187 = arith.constant 80 : index
    %c0_188 = arith.constant 0 : index
    %367 = vector.load %arg12[%c80_187, %c0_188] : memref<100x128xf32, #tpu.memory_space<vmem>>, vector<8x128xf32>
    %368 = vector.broadcast %39 : vector<1x128xf32> to vector<8x128xf32>
    %369 = arith.mulf %367, %368 : vector<8x128xf32>
    %370 = arith.addf %366, %369 : vector<8x128xf32>
    %c81_189 = arith.constant 81 : index
    %c0_190 = arith.constant 0 : index
    %371 = vector.load %arg12[%c81_189, %c0_190] : memref<100x128xf32, #tpu.memory_space<vmem>>, vector<8x128xf32>
    %372 = vector.broadcast %40 : vector<1x128xf32> to vector<8x128xf32>
    %373 = arith.mulf %371, %372 : vector<8x128xf32>
    %374 = arith.addf %370, %373 : vector<8x128xf32>
    %c82_191 = arith.constant 82 : index
    %c0_192 = arith.constant 0 : index
    %375 = vector.load %arg12[%c82_191, %c0_192] : memref<100x128xf32, #tpu.memory_space<vmem>>, vector<8x128xf32>
    %376 = vector.broadcast %41 : vector<1x128xf32> to vector<8x128xf32>
    %377 = arith.mulf %375, %376 : vector<8x128xf32>
    %378 = arith.addf %374, %377 : vector<8x128xf32>
    %c90 = arith.constant 90 : index
    %c0_193 = arith.constant 0 : index
    %379 = vector.load %arg12[%c90, %c0_193] : memref<100x128xf32, #tpu.memory_space<vmem>>, vector<8x128xf32>
    %380 = vector.broadcast %42 : vector<1x128xf32> to vector<8x128xf32>
    %381 = arith.mulf %379, %380 : vector<8x128xf32>
    %382 = arith.addf %378, %381 : vector<8x128xf32>
    %c91 = arith.constant 91 : index
    %c0_194 = arith.constant 0 : index
    %383 = vector.load %arg12[%c91, %c0_194] : memref<100x128xf32, #tpu.memory_space<vmem>>, vector<8x128xf32>
    %384 = vector.broadcast %43 : vector<1x128xf32> to vector<8x128xf32>
    %385 = arith.mulf %383, %384 : vector<8x128xf32>
    %386 = arith.addf %382, %385 : vector<8x128xf32>
    %c92 = arith.constant 92 : index
    %c0_195 = arith.constant 0 : index
    %387 = vector.load %arg12[%c92, %c0_195] : memref<100x128xf32, #tpu.memory_space<vmem>>, vector<8x128xf32>
    %388 = vector.broadcast %44 : vector<1x128xf32> to vector<8x128xf32>
    %389 = arith.mulf %387, %388 : vector<8x128xf32>
    %390 = arith.addf %386, %389 : vector<8x128xf32>
    %391 = vector.broadcast %45 : vector<1x128xf32> to vector<8x128xf32>
    %392 = arith.addf %390, %391 : vector<8x128xf32>
    %cst_196 = arith.constant 0.000000e+00 : f32
    %cst_197 = arith.constant 6.000000e+00 : f32
    %393 = vector.broadcast %cst_196 : f32 to vector<8x128xf32>
    %394 = arith.maximumf %393, %392 : vector<8x128xf32>
    %395 = vector.broadcast %cst_197 : f32 to vector<8x128xf32>
    %396 = arith.minimumf %395, %394 : vector<8x128xf32>
    %c56 = arith.constant 56 : index
    %c0_198 = arith.constant 0 : index
    %397 = vector.load %arg13[%c56, %c0_198] : memref<64x128xf32, #tpu.memory_space<vmem>>, vector<8x128xf32>
    tpu.vector_store %arg13[%c56, %c0_198], %396 {strides = array<i32>} : memref<64x128xf32, #tpu.memory_space<vmem>>, vector<8x128xf32>,
    %c0_199 = arith.constant 0 : index
    %c0_200 = arith.constant 0 : index
    %398 = vector.load %arg13[%c0_199, %c0_200] : memref<64x128xf32, #tpu.memory_space<vmem>>, vector<64x128xf32>
    %c0_201 = arith.constant 0 : index
    %c0_202 = arith.constant 0 : index
    %399 = vector.load %arg5[%c0_201, %c0_202] : memref<128x128xf32, #tpu.memory_space<vmem>>, vector<128x128xf32>
    %cst_203 = arith.constant dense<0.000000e+00> : vector<64x128xf32>
    %400 = tpu.matmul %398, %399, %cst_203 {dimension_numbers = #tpu.dot_dimension_numbers<[1], [0], [0], [1], [0, 0, 1, 1], [], []>} : vector<64x128xf32>, vector<128x128xf32>, vector<64x128xf32> -> vector<64x128xf32>
    %c3_204 = arith.constant 3 : index
    %c0_205 = arith.constant 0 : index
    %401 = vector.load %arg8[%c3_204, %c0_205] : memref<8x128xf32, #tpu.memory_space<vmem>>, vector<1x128xf32>
    %402 = vector.broadcast %401 : vector<1x128xf32> to vector<64x128xf32>
    %403 = arith.addf %400, %402 : vector<64x128xf32>
    %404 = arith.addf %403, %7 : vector<64x128xf32>
    %c0_206 = arith.constant 0 : index
    %c0_207 = arith.constant 0 : index
    %405 = vector.load %arg10[%c0_206, %c0_207] : memref<64x128xf32, #tpu.memory_space<vmem>>, vector<64x128xf32>
    tpu.vector_store %arg10[%c0_206, %c0_207], %404 {strides = array<i32>} : memref<64x128xf32, #tpu.memory_space<vmem>>, vector<64x128xf32>,
    %cst_208 = arith.constant 0.000000e+00 : f32
    %406 = vector.broadcast %cst_208 : f32 to vector<100x128xf32>
    %c0_209 = arith.constant 0 : index
    %c0_210 = arith.constant 0 : index
    %407 = vector.load %arg12[%c0_209, %c0_210] : memref<100x128xf32, #tpu.memory_space<vmem>>, vector<100x128xf32>
    tpu.vector_store %arg12[%c0_209, %c0_210], %406 {strides = array<i32>} : memref<100x128xf32, #tpu.memory_space<vmem>>, vector<100x128xf32>,
    %408 = vector.extract_strided_slice %404 {offsets = [0, 0], sizes = [8, 128], strides = [1, 1]} : vector<64x128xf32> to vector<8x128xf32>
    %c11_211 = arith.constant 11 : index
    %c0_212 = arith.constant 0 : index
    %409 = vector.load %arg12[%c11_211, %c0_212] : memref<100x128xf32, #tpu.memory_space<vmem>>, vector<8x128xf32>
    tpu.vector_store %arg12[%c11_211, %c0_212], %408 {strides = array<i32>} : memref<100x128xf32, #tpu.memory_space<vmem>>, vector<8x128xf32>,
    %410 = vector.extract_strided_slice %404 {offsets = [8, 0], sizes = [8, 128], strides = [1, 1]} : vector<64x128xf32> to vector<8x128xf32>
    %c21_213 = arith.constant 21 : index
    %c0_214 = arith.constant 0 : index
    %411 = vector.load %arg12[%c21_213, %c0_214] : memref<100x128xf32, #tpu.memory_space<vmem>>, vector<8x128xf32>
    tpu.vector_store %arg12[%c21_213, %c0_214], %410 {strides = array<i32>} : memref<100x128xf32, #tpu.memory_space<vmem>>, vector<8x128xf32>,
    %412 = vector.extract_strided_slice %404 {offsets = [16, 0], sizes = [8, 128], strides = [1, 1]} : vector<64x128xf32> to vector<8x128xf32>
    %c31_215 = arith.constant 31 : index
    %c0_216 = arith.constant 0 : index
    %413 = vector.load %arg12[%c31_215, %c0_216] : memref<100x128xf32, #tpu.memory_space<vmem>>, vector<8x128xf32>
    tpu.vector_store %arg12[%c31_215, %c0_216], %412 {strides = array<i32>} : memref<100x128xf32, #tpu.memory_space<vmem>>, vector<8x128xf32>,
    %414 = vector.extract_strided_slice %404 {offsets = [24, 0], sizes = [8, 128], strides = [1, 1]} : vector<64x128xf32> to vector<8x128xf32>
    %c41_217 = arith.constant 41 : index
    %c0_218 = arith.constant 0 : index
    %415 = vector.load %arg12[%c41_217, %c0_218] : memref<100x128xf32, #tpu.memory_space<vmem>>, vector<8x128xf32>
    tpu.vector_store %arg12[%c41_217, %c0_218], %414 {strides = array<i32>} : memref<100x128xf32, #tpu.memory_space<vmem>>, vector<8x128xf32>,
    %416 = vector.extract_strided_slice %404 {offsets = [32, 0], sizes = [8, 128], strides = [1, 1]} : vector<64x128xf32> to vector<8x128xf32>
    %c51_219 = arith.constant 51 : index
    %c0_220 = arith.constant 0 : index
    %417 = vector.load %arg12[%c51_219, %c0_220] : memref<100x128xf32, #tpu.memory_space<vmem>>, vector<8x128xf32>
    tpu.vector_store %arg12[%c51_219, %c0_220], %416 {strides = array<i32>} : memref<100x128xf32, #tpu.memory_space<vmem>>, vector<8x128xf32>,
    %418 = vector.extract_strided_slice %404 {offsets = [40, 0], sizes = [8, 128], strides = [1, 1]} : vector<64x128xf32> to vector<8x128xf32>
    %c61_221 = arith.constant 61 : index
    %c0_222 = arith.constant 0 : index
    %419 = vector.load %arg12[%c61_221, %c0_222] : memref<100x128xf32, #tpu.memory_space<vmem>>, vector<8x128xf32>
    tpu.vector_store %arg12[%c61_221, %c0_222], %418 {strides = array<i32>} : memref<100x128xf32, #tpu.memory_space<vmem>>, vector<8x128xf32>,
    %420 = vector.extract_strided_slice %404 {offsets = [48, 0], sizes = [8, 128], strides = [1, 1]} : vector<64x128xf32> to vector<8x128xf32>
    %c71_223 = arith.constant 71 : index
    %c0_224 = arith.constant 0 : index
    %421 = vector.load %arg12[%c71_223, %c0_224] : memref<100x128xf32, #tpu.memory_space<vmem>>, vector<8x128xf32>
    tpu.vector_store %arg12[%c71_223, %c0_224], %420 {strides = array<i32>} : memref<100x128xf32, #tpu.memory_space<vmem>>, vector<8x128xf32>,
    %422 = vector.extract_strided_slice %404 {offsets = [56, 0], sizes = [8, 128], strides = [1, 1]} : vector<64x128xf32> to vector<8x128xf32>
    %c81_225 = arith.constant 81 : index
    %c0_226 = arith.constant 0 : index
    %423 = vector.load %arg12[%c81_225, %c0_226] : memref<100x128xf32, #tpu.memory_space<vmem>>, vector<8x128xf32>
    tpu.vector_store %arg12[%c81_225, %c0_226], %422 {strides = array<i32>} : memref<100x128xf32, #tpu.memory_space<vmem>>, vector<8x128xf32>,
    %c0_227 = arith.constant 0 : index
    %c0_228 = arith.constant 0 : index
    %424 = vector.load %arg6[%c0_227, %c0_228] : memref<9x128xf32, #tpu.memory_space<vmem>>, vector<1x128xf32>
    %c1_229 = arith.constant 1 : index
    %c0_230 = arith.constant 0 : index
    %425 = vector.load %arg6[%c1_229, %c0_230] : memref<9x128xf32, #tpu.memory_space<vmem>>, vector<1x128xf32>
    %c2_231 = arith.constant 2 : index
    %c0_232 = arith.constant 0 : index
    %426 = vector.load %arg6[%c2_231, %c0_232] : memref<9x128xf32, #tpu.memory_space<vmem>>, vector<1x128xf32>
    %c3_233 = arith.constant 3 : index
    %c0_234 = arith.constant 0 : index
    %427 = vector.load %arg6[%c3_233, %c0_234] : memref<9x128xf32, #tpu.memory_space<vmem>>, vector<1x128xf32>
    %c4_235 = arith.constant 4 : index
    %c0_236 = arith.constant 0 : index
    %428 = vector.load %arg6[%c4_235, %c0_236] : memref<9x128xf32, #tpu.memory_space<vmem>>, vector<1x128xf32>
    %c5_237 = arith.constant 5 : index
    %c0_238 = arith.constant 0 : index
    %429 = vector.load %arg6[%c5_237, %c0_238] : memref<9x128xf32, #tpu.memory_space<vmem>>, vector<1x128xf32>
    %c6_239 = arith.constant 6 : index
    %c0_240 = arith.constant 0 : index
    %430 = vector.load %arg6[%c6_239, %c0_240] : memref<9x128xf32, #tpu.memory_space<vmem>>, vector<1x128xf32>
    %c7_241 = arith.constant 7 : index
    %c0_242 = arith.constant 0 : index
    %431 = vector.load %arg6[%c7_241, %c0_242] : memref<9x128xf32, #tpu.memory_space<vmem>>, vector<1x128xf32>
    %c8_243 = arith.constant 8 : index
    %c0_244 = arith.constant 0 : index
    %432 = vector.load %arg6[%c8_243, %c0_244] : memref<9x128xf32, #tpu.memory_space<vmem>>, vector<1x128xf32>
    %c4_245 = arith.constant 4 : index
    %c0_246 = arith.constant 0 : index
    %433 = vector.load %arg8[%c4_245, %c0_246] : memref<8x128xf32, #tpu.memory_space<vmem>>, vector<1x128xf32>
    %cst_247 = arith.constant 0.000000e+00 : f32
    %434 = vector.broadcast %cst_247 : f32 to vector<4x128xf32>
    %c0_248 = arith.constant 0 : index
    %c0_249 = arith.constant 0 : index
    %435 = tpu.strided_load %arg12[%c0_248, %c0_249] {strides = array<i32: 2, 1>} : memref<100x128xf32, #tpu.memory_space<vmem>>, vector<4x128xf32>
    %436 = vector.broadcast %424 : vector<1x128xf32> to vector<4x128xf32>
    %437 = arith.mulf %435, %436 : vector<4x128xf32>
    %438 = arith.addf %434, %437 : vector<4x128xf32>
    %c1_250 = arith.constant 1 : index
    %c0_251 = arith.constant 0 : index
    %439 = tpu.strided_load %arg12[%c1_250, %c0_251] {strides = array<i32: 2, 1>} : memref<100x128xf32, #tpu.memory_space<vmem>>, vector<4x128xf32>
    %440 = vector.broadcast %425 : vector<1x128xf32> to vector<4x128xf32>
    %441 = arith.mulf %439, %440 : vector<4x128xf32>
    %442 = arith.addf %438, %441 : vector<4x128xf32>
    %c2_252 = arith.constant 2 : index
    %c0_253 = arith.constant 0 : index
    %443 = tpu.strided_load %arg12[%c2_252, %c0_253] {strides = array<i32: 2, 1>} : memref<100x128xf32, #tpu.memory_space<vmem>>, vector<4x128xf32>
    %444 = vector.broadcast %426 : vector<1x128xf32> to vector<4x128xf32>
    %445 = arith.mulf %443, %444 : vector<4x128xf32>
    %446 = arith.addf %442, %445 : vector<4x128xf32>
    %c10_254 = arith.constant 10 : index
    %c0_255 = arith.constant 0 : index
    %447 = tpu.strided_load %arg12[%c10_254, %c0_255] {strides = array<i32: 2, 1>} : memref<100x128xf32, #tpu.memory_space<vmem>>, vector<4x128xf32>
    %448 = vector.broadcast %427 : vector<1x128xf32> to vector<4x128xf32>
    %449 = arith.mulf %447, %448 : vector<4x128xf32>
    %450 = arith.addf %446, %449 : vector<4x128xf32>
    %c11_256 = arith.constant 11 : index
    %c0_257 = arith.constant 0 : index
    %451 = tpu.strided_load %arg12[%c11_256, %c0_257] {strides = array<i32: 2, 1>} : memref<100x128xf32, #tpu.memory_space<vmem>>, vector<4x128xf32>
    %452 = vector.broadcast %428 : vector<1x128xf32> to vector<4x128xf32>
    %453 = arith.mulf %451, %452 : vector<4x128xf32>
    %454 = arith.addf %450, %453 : vector<4x128xf32>
    %c12_258 = arith.constant 12 : index
    %c0_259 = arith.constant 0 : index
    %455 = tpu.strided_load %arg12[%c12_258, %c0_259] {strides = array<i32: 2, 1>} : memref<100x128xf32, #tpu.memory_space<vmem>>, vector<4x128xf32>
    %456 = vector.broadcast %429 : vector<1x128xf32> to vector<4x128xf32>
    %457 = arith.mulf %455, %456 : vector<4x128xf32>
    %458 = arith.addf %454, %457 : vector<4x128xf32>
    %c20_260 = arith.constant 20 : index
    %c0_261 = arith.constant 0 : index
    %459 = tpu.strided_load %arg12[%c20_260, %c0_261] {strides = array<i32: 2, 1>} : memref<100x128xf32, #tpu.memory_space<vmem>>, vector<4x128xf32>
    %460 = vector.broadcast %430 : vector<1x128xf32> to vector<4x128xf32>
    %461 = arith.mulf %459, %460 : vector<4x128xf32>
    %462 = arith.addf %458, %461 : vector<4x128xf32>
    %c21_262 = arith.constant 21 : index
    %c0_263 = arith.constant 0 : index
    %463 = tpu.strided_load %arg12[%c21_262, %c0_263] {strides = array<i32: 2, 1>} : memref<100x128xf32, #tpu.memory_space<vmem>>, vector<4x128xf32>
    %464 = vector.broadcast %431 : vector<1x128xf32> to vector<4x128xf32>
    %465 = arith.mulf %463, %464 : vector<4x128xf32>
    %466 = arith.addf %462, %465 : vector<4x128xf32>
    %c22_264 = arith.constant 22 : index
    %c0_265 = arith.constant 0 : index
    %467 = tpu.strided_load %arg12[%c22_264, %c0_265] {strides = array<i32: 2, 1>} : memref<100x128xf32, #tpu.memory_space<vmem>>, vector<4x128xf32>
    %468 = vector.broadcast %432 : vector<1x128xf32> to vector<4x128xf32>
    %469 = arith.mulf %467, %468 : vector<4x128xf32>
    %470 = arith.addf %466, %469 : vector<4x128xf32>
    %471 = vector.broadcast %433 : vector<1x128xf32> to vector<4x128xf32>
    %472 = arith.addf %470, %471 : vector<4x128xf32>
    %cst_266 = arith.constant 0.000000e+00 : f32
    %cst_267 = arith.constant 6.000000e+00 : f32
    %473 = vector.broadcast %cst_266 : f32 to vector<4x128xf32>
    %474 = arith.maximumf %473, %472 : vector<4x128xf32>
    %475 = vector.broadcast %cst_267 : f32 to vector<4x128xf32>
    %476 = arith.minimumf %475, %474 : vector<4x128xf32>
    %c0_268 = arith.constant 0 : index
    %c0_269 = arith.constant 0 : index
    %477 = vector.load %arg14[%c0_268, %c0_269] : memref<16x128xf32, #tpu.memory_space<vmem>>, vector<4x128xf32>
    tpu.vector_store %arg14[%c0_268, %c0_269], %476 {strides = array<i32>} : memref<16x128xf32, #tpu.memory_space<vmem>>, vector<4x128xf32>,
    %cst_270 = arith.constant 0.000000e+00 : f32
    %478 = vector.broadcast %cst_270 : f32 to vector<4x128xf32>
    %c20_271 = arith.constant 20 : index
    %c0_272 = arith.constant 0 : index
    %479 = tpu.strided_load %arg12[%c20_271, %c0_272] {strides = array<i32: 2, 1>} : memref<100x128xf32, #tpu.memory_space<vmem>>, vector<4x128xf32>
    %480 = vector.broadcast %424 : vector<1x128xf32> to vector<4x128xf32>
    %481 = arith.mulf %479, %480 : vector<4x128xf32>
    %482 = arith.addf %478, %481 : vector<4x128xf32>
    %c21_273 = arith.constant 21 : index
    %c0_274 = arith.constant 0 : index
    %483 = tpu.strided_load %arg12[%c21_273, %c0_274] {strides = array<i32: 2, 1>} : memref<100x128xf32, #tpu.memory_space<vmem>>, vector<4x128xf32>
    %484 = vector.broadcast %425 : vector<1x128xf32> to vector<4x128xf32>
    %485 = arith.mulf %483, %484 : vector<4x128xf32>
    %486 = arith.addf %482, %485 : vector<4x128xf32>
    %c22_275 = arith.constant 22 : index
    %c0_276 = arith.constant 0 : index
    %487 = tpu.strided_load %arg12[%c22_275, %c0_276] {strides = array<i32: 2, 1>} : memref<100x128xf32, #tpu.memory_space<vmem>>, vector<4x128xf32>
    %488 = vector.broadcast %426 : vector<1x128xf32> to vector<4x128xf32>
    %489 = arith.mulf %487, %488 : vector<4x128xf32>
    %490 = arith.addf %486, %489 : vector<4x128xf32>
    %c30_277 = arith.constant 30 : index
    %c0_278 = arith.constant 0 : index
    %491 = tpu.strided_load %arg12[%c30_277, %c0_278] {strides = array<i32: 2, 1>} : memref<100x128xf32, #tpu.memory_space<vmem>>, vector<4x128xf32>
    %492 = vector.broadcast %427 : vector<1x128xf32> to vector<4x128xf32>
    %493 = arith.mulf %491, %492 : vector<4x128xf32>
    %494 = arith.addf %490, %493 : vector<4x128xf32>
    %c31_279 = arith.constant 31 : index
    %c0_280 = arith.constant 0 : index
    %495 = tpu.strided_load %arg12[%c31_279, %c0_280] {strides = array<i32: 2, 1>} : memref<100x128xf32, #tpu.memory_space<vmem>>, vector<4x128xf32>
    %496 = vector.broadcast %428 : vector<1x128xf32> to vector<4x128xf32>
    %497 = arith.mulf %495, %496 : vector<4x128xf32>
    %498 = arith.addf %494, %497 : vector<4x128xf32>
    %c32_281 = arith.constant 32 : index
    %c0_282 = arith.constant 0 : index
    %499 = tpu.strided_load %arg12[%c32_281, %c0_282] {strides = array<i32: 2, 1>} : memref<100x128xf32, #tpu.memory_space<vmem>>, vector<4x128xf32>
    %500 = vector.broadcast %429 : vector<1x128xf32> to vector<4x128xf32>
    %501 = arith.mulf %499, %500 : vector<4x128xf32>
    %502 = arith.addf %498, %501 : vector<4x128xf32>
    %c40_283 = arith.constant 40 : index
    %c0_284 = arith.constant 0 : index
    %503 = tpu.strided_load %arg12[%c40_283, %c0_284] {strides = array<i32: 2, 1>} : memref<100x128xf32, #tpu.memory_space<vmem>>, vector<4x128xf32>
    %504 = vector.broadcast %430 : vector<1x128xf32> to vector<4x128xf32>
    %505 = arith.mulf %503, %504 : vector<4x128xf32>
    %506 = arith.addf %502, %505 : vector<4x128xf32>
    %c41_285 = arith.constant 41 : index
    %c0_286 = arith.constant 0 : index
    %507 = tpu.strided_load %arg12[%c41_285, %c0_286] {strides = array<i32: 2, 1>} : memref<100x128xf32, #tpu.memory_space<vmem>>, vector<4x128xf32>
    %508 = vector.broadcast %431 : vector<1x128xf32> to vector<4x128xf32>
    %509 = arith.mulf %507, %508 : vector<4x128xf32>
    %510 = arith.addf %506, %509 : vector<4x128xf32>
    %c42_287 = arith.constant 42 : index
    %c0_288 = arith.constant 0 : index
    %511 = tpu.strided_load %arg12[%c42_287, %c0_288] {strides = array<i32: 2, 1>} : memref<100x128xf32, #tpu.memory_space<vmem>>, vector<4x128xf32>
    %512 = vector.broadcast %432 : vector<1x128xf32> to vector<4x128xf32>
    %513 = arith.mulf %511, %512 : vector<4x128xf32>
    %514 = arith.addf %510, %513 : vector<4x128xf32>
    %515 = vector.broadcast %433 : vector<1x128xf32> to vector<4x128xf32>
    %516 = arith.addf %514, %515 : vector<4x128xf32>
    %cst_289 = arith.constant 0.000000e+00 : f32
    %cst_290 = arith.constant 6.000000e+00 : f32
    %517 = vector.broadcast %cst_289 : f32 to vector<4x128xf32>
    %518 = arith.maximumf %517, %516 : vector<4x128xf32>
    %519 = vector.broadcast %cst_290 : f32 to vector<4x128xf32>
    %520 = arith.minimumf %519, %518 : vector<4x128xf32>
    %c4_291 = arith.constant 4 : index
    %c0_292 = arith.constant 0 : index
    %521 = vector.load %arg14[%c4_291, %c0_292] : memref<16x128xf32, #tpu.memory_space<vmem>>, vector<4x128xf32>
    tpu.vector_store %arg14[%c4_291, %c0_292], %520 {strides = array<i32>} : memref<16x128xf32, #tpu.memory_space<vmem>>, vector<4x128xf32>,
    %cst_293 = arith.constant 0.000000e+00 : f32
    %522 = vector.broadcast %cst_293 : f32 to vector<4x128xf32>
    %c40_294 = arith.constant 40 : index
    %c0_295 = arith.constant 0 : index
    %523 = tpu.strided_load %arg12[%c40_294, %c0_295] {strides = array<i32: 2, 1>} : memref<100x128xf32, #tpu.memory_space<vmem>>, vector<4x128xf32>
    %524 = vector.broadcast %424 : vector<1x128xf32> to vector<4x128xf32>
    %525 = arith.mulf %523, %524 : vector<4x128xf32>
    %526 = arith.addf %522, %525 : vector<4x128xf32>
    %c41_296 = arith.constant 41 : index
    %c0_297 = arith.constant 0 : index
    %527 = tpu.strided_load %arg12[%c41_296, %c0_297] {strides = array<i32: 2, 1>} : memref<100x128xf32, #tpu.memory_space<vmem>>, vector<4x128xf32>
    %528 = vector.broadcast %425 : vector<1x128xf32> to vector<4x128xf32>
    %529 = arith.mulf %527, %528 : vector<4x128xf32>
    %530 = arith.addf %526, %529 : vector<4x128xf32>
    %c42_298 = arith.constant 42 : index
    %c0_299 = arith.constant 0 : index
    %531 = tpu.strided_load %arg12[%c42_298, %c0_299] {strides = array<i32: 2, 1>} : memref<100x128xf32, #tpu.memory_space<vmem>>, vector<4x128xf32>
    %532 = vector.broadcast %426 : vector<1x128xf32> to vector<4x128xf32>
    %533 = arith.mulf %531, %532 : vector<4x128xf32>
    %534 = arith.addf %530, %533 : vector<4x128xf32>
    %c50_300 = arith.constant 50 : index
    %c0_301 = arith.constant 0 : index
    %535 = tpu.strided_load %arg12[%c50_300, %c0_301] {strides = array<i32: 2, 1>} : memref<100x128xf32, #tpu.memory_space<vmem>>, vector<4x128xf32>
    %536 = vector.broadcast %427 : vector<1x128xf32> to vector<4x128xf32>
    %537 = arith.mulf %535, %536 : vector<4x128xf32>
    %538 = arith.addf %534, %537 : vector<4x128xf32>
    %c51_302 = arith.constant 51 : index
    %c0_303 = arith.constant 0 : index
    %539 = tpu.strided_load %arg12[%c51_302, %c0_303] {strides = array<i32: 2, 1>} : memref<100x128xf32, #tpu.memory_space<vmem>>, vector<4x128xf32>
    %540 = vector.broadcast %428 : vector<1x128xf32> to vector<4x128xf32>
    %541 = arith.mulf %539, %540 : vector<4x128xf32>
    %542 = arith.addf %538, %541 : vector<4x128xf32>
    %c52_304 = arith.constant 52 : index
    %c0_305 = arith.constant 0 : index
    %543 = tpu.strided_load %arg12[%c52_304, %c0_305] {strides = array<i32: 2, 1>} : memref<100x128xf32, #tpu.memory_space<vmem>>, vector<4x128xf32>
    %544 = vector.broadcast %429 : vector<1x128xf32> to vector<4x128xf32>
    %545 = arith.mulf %543, %544 : vector<4x128xf32>
    %546 = arith.addf %542, %545 : vector<4x128xf32>
    %c60_306 = arith.constant 60 : index
    %c0_307 = arith.constant 0 : index
    %547 = tpu.strided_load %arg12[%c60_306, %c0_307] {strides = array<i32: 2, 1>} : memref<100x128xf32, #tpu.memory_space<vmem>>, vector<4x128xf32>
    %548 = vector.broadcast %430 : vector<1x128xf32> to vector<4x128xf32>
    %549 = arith.mulf %547, %548 : vector<4x128xf32>
    %550 = arith.addf %546, %549 : vector<4x128xf32>
    %c61_308 = arith.constant 61 : index
    %c0_309 = arith.constant 0 : index
    %551 = tpu.strided_load %arg12[%c61_308, %c0_309] {strides = array<i32: 2, 1>} : memref<100x128xf32, #tpu.memory_space<vmem>>, vector<4x128xf32>
    %552 = vector.broadcast %431 : vector<1x128xf32> to vector<4x128xf32>
    %553 = arith.mulf %551, %552 : vector<4x128xf32>
    %554 = arith.addf %550, %553 : vector<4x128xf32>
    %c62_310 = arith.constant 62 : index
    %c0_311 = arith.constant 0 : index
    %555 = tpu.strided_load %arg12[%c62_310, %c0_311] {strides = array<i32: 2, 1>} : memref<100x128xf32, #tpu.memory_space<vmem>>, vector<4x128xf32>
    %556 = vector.broadcast %432 : vector<1x128xf32> to vector<4x128xf32>
    %557 = arith.mulf %555, %556 : vector<4x128xf32>
    %558 = arith.addf %554, %557 : vector<4x128xf32>
    %559 = vector.broadcast %433 : vector<1x128xf32> to vector<4x128xf32>
    %560 = arith.addf %558, %559 : vector<4x128xf32>
    %cst_312 = arith.constant 0.000000e+00 : f32
    %cst_313 = arith.constant 6.000000e+00 : f32
    %561 = vector.broadcast %cst_312 : f32 to vector<4x128xf32>
    %562 = arith.maximumf %561, %560 : vector<4x128xf32>
    %563 = vector.broadcast %cst_313 : f32 to vector<4x128xf32>
    %564 = arith.minimumf %563, %562 : vector<4x128xf32>
    %c8_314 = arith.constant 8 : index
    %c0_315 = arith.constant 0 : index
    %565 = vector.load %arg14[%c8_314, %c0_315] : memref<16x128xf32, #tpu.memory_space<vmem>>, vector<4x128xf32>
    tpu.vector_store %arg14[%c8_314, %c0_315], %564 {strides = array<i32>} : memref<16x128xf32, #tpu.memory_space<vmem>>, vector<4x128xf32>,
    %cst_316 = arith.constant 0.000000e+00 : f32
    %566 = vector.broadcast %cst_316 : f32 to vector<4x128xf32>
    %c60_317 = arith.constant 60 : index
    %c0_318 = arith.constant 0 : index
    %567 = tpu.strided_load %arg12[%c60_317, %c0_318] {strides = array<i32: 2, 1>} : memref<100x128xf32, #tpu.memory_space<vmem>>, vector<4x128xf32>
    %568 = vector.broadcast %424 : vector<1x128xf32> to vector<4x128xf32>
    %569 = arith.mulf %567, %568 : vector<4x128xf32>
    %570 = arith.addf %566, %569 : vector<4x128xf32>
    %c61_319 = arith.constant 61 : index
    %c0_320 = arith.constant 0 : index
    %571 = tpu.strided_load %arg12[%c61_319, %c0_320] {strides = array<i32: 2, 1>} : memref<100x128xf32, #tpu.memory_space<vmem>>, vector<4x128xf32>
    %572 = vector.broadcast %425 : vector<1x128xf32> to vector<4x128xf32>
    %573 = arith.mulf %571, %572 : vector<4x128xf32>
    %574 = arith.addf %570, %573 : vector<4x128xf32>
    %c62_321 = arith.constant 62 : index
    %c0_322 = arith.constant 0 : index
    %575 = tpu.strided_load %arg12[%c62_321, %c0_322] {strides = array<i32: 2, 1>} : memref<100x128xf32, #tpu.memory_space<vmem>>, vector<4x128xf32>
    %576 = vector.broadcast %426 : vector<1x128xf32> to vector<4x128xf32>
    %577 = arith.mulf %575, %576 : vector<4x128xf32>
    %578 = arith.addf %574, %577 : vector<4x128xf32>
    %c70_323 = arith.constant 70 : index
    %c0_324 = arith.constant 0 : index
    %579 = tpu.strided_load %arg12[%c70_323, %c0_324] {strides = array<i32: 2, 1>} : memref<100x128xf32, #tpu.memory_space<vmem>>, vector<4x128xf32>
    %580 = vector.broadcast %427 : vector<1x128xf32> to vector<4x128xf32>
    %581 = arith.mulf %579, %580 : vector<4x128xf32>
    %582 = arith.addf %578, %581 : vector<4x128xf32>
    %c71_325 = arith.constant 71 : index
    %c0_326 = arith.constant 0 : index
    %583 = tpu.strided_load %arg12[%c71_325, %c0_326] {strides = array<i32: 2, 1>} : memref<100x128xf32, #tpu.memory_space<vmem>>, vector<4x128xf32>
    %584 = vector.broadcast %428 : vector<1x128xf32> to vector<4x128xf32>
    %585 = arith.mulf %583, %584 : vector<4x128xf32>
    %586 = arith.addf %582, %585 : vector<4x128xf32>
    %c72_327 = arith.constant 72 : index
    %c0_328 = arith.constant 0 : index
    %587 = tpu.strided_load %arg12[%c72_327, %c0_328] {strides = array<i32: 2, 1>} : memref<100x128xf32, #tpu.memory_space<vmem>>, vector<4x128xf32>
    %588 = vector.broadcast %429 : vector<1x128xf32> to vector<4x128xf32>
    %589 = arith.mulf %587, %588 : vector<4x128xf32>
    %590 = arith.addf %586, %589 : vector<4x128xf32>
    %c80_329 = arith.constant 80 : index
    %c0_330 = arith.constant 0 : index
    %591 = tpu.strided_load %arg12[%c80_329, %c0_330] {strides = array<i32: 2, 1>} : memref<100x128xf32, #tpu.memory_space<vmem>>, vector<4x128xf32>
    %592 = vector.broadcast %430 : vector<1x128xf32> to vector<4x128xf32>
    %593 = arith.mulf %591, %592 : vector<4x128xf32>
    %594 = arith.addf %590, %593 : vector<4x128xf32>
    %c81_331 = arith.constant 81 : index
    %c0_332 = arith.constant 0 : index
    %595 = tpu.strided_load %arg12[%c81_331, %c0_332] {strides = array<i32: 2, 1>} : memref<100x128xf32, #tpu.memory_space<vmem>>, vector<4x128xf32>
    %596 = vector.broadcast %431 : vector<1x128xf32> to vector<4x128xf32>
    %597 = arith.mulf %595, %596 : vector<4x128xf32>
    %598 = arith.addf %594, %597 : vector<4x128xf32>
    %c82_333 = arith.constant 82 : index
    %c0_334 = arith.constant 0 : index
    %599 = tpu.strided_load %arg12[%c82_333, %c0_334] {strides = array<i32: 2, 1>} : memref<100x128xf32, #tpu.memory_space<vmem>>, vector<4x128xf32>
    %600 = vector.broadcast %432 : vector<1x128xf32> to vector<4x128xf32>
    %601 = arith.mulf %599, %600 : vector<4x128xf32>
    %602 = arith.addf %598, %601 : vector<4x128xf32>
    %603 = vector.broadcast %433 : vector<1x128xf32> to vector<4x128xf32>
    %604 = arith.addf %602, %603 : vector<4x128xf32>
    %cst_335 = arith.constant 0.000000e+00 : f32
    %cst_336 = arith.constant 6.000000e+00 : f32
    %605 = vector.broadcast %cst_335 : f32 to vector<4x128xf32>
    %606 = arith.maximumf %605, %604 : vector<4x128xf32>
    %607 = vector.broadcast %cst_336 : f32 to vector<4x128xf32>
    %608 = arith.minimumf %607, %606 : vector<4x128xf32>
    %c12_337 = arith.constant 12 : index
    %c0_338 = arith.constant 0 : index
    %609 = vector.load %arg14[%c12_337, %c0_338] : memref<16x128xf32, #tpu.memory_space<vmem>>, vector<4x128xf32>
    tpu.vector_store %arg14[%c12_337, %c0_338], %608 {strides = array<i32>} : memref<16x128xf32, #tpu.memory_space<vmem>>, vector<4x128xf32>,
    %c0_339 = arith.constant 0 : index
    %c0_340 = arith.constant 0 : index
    %610 = vector.load %arg14[%c0_339, %c0_340] : memref<16x128xf32, #tpu.memory_space<vmem>>, vector<16x128xf32>
    %c0_341 = arith.constant 0 : index
    %c0_342 = arith.constant 0 : index
    %611 = vector.load %arg7[%c0_341, %c0_342] : memref<128x128xf32, #tpu.memory_space<vmem>>, vector<128x128xf32>
    %cst_343 = arith.constant dense<0.000000e+00> : vector<16x128xf32>
    %612 = tpu.matmul %610, %611, %cst_343 {dimension_numbers = #tpu.dot_dimension_numbers<[1], [0], [0], [1], [0, 0, 1, 1], [], []>} : vector<16x128xf32>, vector<128x128xf32>, vector<16x128xf32> -> vector<16x128xf32>
    %c5_344 = arith.constant 5 : index
    %c0_345 = arith.constant 0 : index
    %613 = vector.load %arg8[%c5_344, %c0_345] : memref<8x128xf32, #tpu.memory_space<vmem>>, vector<1x128xf32>
    %614 = vector.broadcast %613 : vector<1x128xf32> to vector<16x128xf32>
    %615 = arith.addf %612, %614 : vector<16x128xf32>
    %c0_346 = arith.constant 0 : index
    %c0_347 = arith.constant 0 : index
    %616 = vector.load %arg11[%c0_346, %c0_347] : memref<16x128xf32, #tpu.memory_space<vmem>>, vector<16x128xf32>
    tpu.vector_store %arg11[%c0_346, %c0_347], %615 {strides = array<i32>} : memref<16x128xf32, #tpu.memory_space<vmem>>, vector<16x128xf32>,
    return
  }
  func.func @transform_0(%arg0: i32) -> (i32, i32) {
    %c0_i32 = arith.constant 0 : i32
    %c0_i32_0 = arith.constant 0 : i32
    return %arg0, %c0_i32 : i32, i32
  }
  func.func @transform_1(%arg0: i32) -> (i32, i32) {
    %c0_i32 = arith.constant 0 : i32
    %c0_i32_0 = arith.constant 0 : i32
    %c0_i32_1 = arith.constant 0 : i32
    return %c0_i32, %c0_i32_0 : i32, i32
  }
  func.func @transform_2(%arg0: i32) -> (i32, i32) {
    %c0_i32 = arith.constant 0 : i32
    %c0_i32_0 = arith.constant 0 : i32
    %c0_i32_1 = arith.constant 0 : i32
    return %c0_i32, %c0_i32_0 : i32, i32
  }
  func.func @transform_3(%arg0: i32) -> (i32, i32) {
    %c0_i32 = arith.constant 0 : i32
    %c0_i32_0 = arith.constant 0 : i32
    %c0_i32_1 = arith.constant 0 : i32
    return %c0_i32, %c0_i32_0 : i32, i32
  }
  func.func @transform_4(%arg0: i32) -> (i32, i32) {
    %c0_i32 = arith.constant 0 : i32
    %c0_i32_0 = arith.constant 0 : i32
    %c0_i32_1 = arith.constant 0 : i32
    return %c0_i32, %c0_i32_0 : i32, i32
  }
  func.func @transform_5(%arg0: i32) -> (i32, i32) {
    %c0_i32 = arith.constant 0 : i32
    %c0_i32_0 = arith.constant 0 : i32
    %c0_i32_1 = arith.constant 0 : i32
    return %c0_i32, %c0_i32_0 : i32, i32
  }
  func.func @transform_6(%arg0: i32) -> (i32, i32) {
    %c0_i32 = arith.constant 0 : i32
    %c0_i32_0 = arith.constant 0 : i32
    %c0_i32_1 = arith.constant 0 : i32
    return %c0_i32, %c0_i32_0 : i32, i32
  }
  func.func @transform_7(%arg0: i32) -> (i32, i32) {
    %c0_i32 = arith.constant 0 : i32
    %c0_i32_0 = arith.constant 0 : i32
    %c0_i32_1 = arith.constant 0 : i32
    return %c0_i32, %c0_i32_0 : i32, i32
  }
  func.func @transform_8(%arg0: i32) -> (i32, i32) {
    %c0_i32 = arith.constant 0 : i32
    %c0_i32_0 = arith.constant 0 : i32
    return %arg0, %c0_i32 : i32, i32
  }
  func.func @transform_9(%arg0: i32) -> (i32, i32) {
    %c0_i32 = arith.constant 0 : i32
    %c0_i32_0 = arith.constant 0 : i32
    return %arg0, %c0_i32 : i32, i32
  }
  func.func @transform_10(%arg0: i32) -> (i32, i32) {
    %c0_i32 = arith.constant 0 : i32
    %c0_i32_0 = arith.constant 0 : i32
    return %arg0, %c0_i32 : i32, i32
  }
}

</mosaic_0001>

<bundles_post_ra>
// kernel: _lambda_.1
= control target key start
LH: loop header
LB: loop body
LE: loop exit
PB: predicated region body
PF: predicated region fallthrough
CT: control target
= control target key end

     0   :  { %s1418_s13 = smov 0   ;;  %s1971_s0 = inlined_call_operand.vmem [shape: f32[128,27], index: 0, kind: input, shape index: {}]   ;;  %s1972_s1 = inlined_call_operand.vmem [shape: f32[27,128], index: 1, kind: input, shape index: {}]   ;;  %s1973_s2 = inlined_call_operand.vmem [shape: f32[128,128], index: 2, kind: input, shape index: {}]   ;;  %s1974_s3 = inlined_call_operand.vmem [shape: f32[9,128], index: 3, kind: input, shape index: {}]   ;;  %s1975_s4 = inlined_call_operand.vmem [shape: f32[128,128], index: 4, kind: input, shape index: {}]   ;;  %s1976_s5 = inlined_call_operand.vmem [shape: f32[9,128], index: 5, kind: input, shape index: {}]   ;;  %s1977_s6 = inlined_call_operand.vmem [shape: f32[128,128], index: 6, kind: input, shape index: {}]   ;;  %s1978_s7 = inlined_call_operand.vmem [shape: f32[8,128], index: 7, kind: input, shape index: {}]   ;;  %s1979_s8 = inlined_call_operand.vmem [shape: f32[128,128], index: 8, kind: output, shape index: {0}]   ;;  %s1980_s9 = inlined_call_operand.vmem [shape: f32[128,128], index: 9, kind: output, shape index: {1}]   ;;  %s1981_s10 = inlined_call_operand.vmem [shape: f32[32,128], index: 10, kind: output, shape index: {2}]  }
   0x1 LB: > { %s1297_s14 = sadd.s32 4294967295, %s1360_s13   ;;  %p1301_p0 = scmp.ge.s32.totalorder %s1360_s13, 1  ;;  %s1360_s13 = sphi %s1418_s13, %s21_s13  }
   0x2   : > { %p318_p1 = scmp.lt.s32.totalorder %s1360_s13, 3 }
   0x4   : > { %p319_p2 = pnand %p1301_p0, %p318_p1 }
   0x5   : > { %s1302_s19 = sshll.u32 (!%p319_p2), %s1297_s14, 3 }
   0x6   : > { %322 = sbr.rel (%p319_p2) target bundleno = 669 (0x29d), region = 52  ;;  %p367_p3 = scmp.lt.s32.totalorder (!%p319_p2), %s1302_s19, 15 }
   0xb   : > { %v401_v0 = vld [vmem:[%s1972_s1 + $0x18] sm:$0x7]  ;;  %vm429_vm0 = vcmask 1042432   ;;  %v400_v1 = vld [vmem:[%s1972_s1 + $0x10] sm:$0xff]  ;;  %v399_v2 = vld [vmem:[%s1972_s1 + $0x8] sm:$0xff]  ;;  %s1983_s19 = smov (!%p367_p3, %s1302_s19), 15 }
   0xc   : > { %1310 = vmatpush.msk.msra.mxu0 %vm429_vm0, %v401_v0  ;;  %v398_v3 = vld [vmem:[%s1972_s1] sm:$0xff]  ;;  %s1440_s24 = sshll.u32 %s1983_s19, 3  ;;  %vm404_vm1 = vcmask 220160   ;;  %v505_v8 = vld [vmem:[%s1973_s2 + $0x78] sm:$0xff]  ;;  %v504_v9 = vld [vmem:[%s1973_s2 + $0x70] sm:$0xff]  ;;  %v1362_v53 = vmov 0.0  }
   0xd   : > { %s1446_s27 = scalar_lea.vmem %s1971_s0, %s1440_s24  ;;  %508 = vmatpush.msra.mxu1 %v505_v8  ;;  %v503_v10 = vld [vmem:[%s1973_s2 + $0x68] sm:$0xff]  ;;  %v502_v11 = vld [vmem:[%s1973_s2 + $0x60] sm:$0xff]  ;;  %v501_v13 = vld [vmem:[%s1973_s2 + $0x58] sm:$0xff]  ;;  %s1519_s11 = scalar_lea.vmem %s1979_s8, %s1440_s24  ;;  %566 = vst [vmem:[#allocation2 + $0x8] sm:$0xff] %v1362_v53 }
   0xe   : > { %446 = vmatpush.msra.mxu0 %v400_v1  ;;  %v390_v4 = vld [vmem:[%s1446_s27] sm:$0xff]  ;;  %v391_v5 = vld [vmem:[%s1446_s27 + $0x8] sm:$0xff]  ;;  %v392_v6 = vld [vmem:[%s1446_s27 + $0x10] sm:$0xff]  ;;  %567 = vst [vmem:[#allocation2 + $0x10] sm:$0xff] %v1362_v53  ;;  %s1813_s30 = scalar_lea.vmem %s1980_s9, %s1440_s24 }
   0xf   : > { %v393_v7 = vld [vmem:[%s1446_s27 + $0x18] sm:$0xff]  ;;  %509 = vmatpush.msra.mxu1 %v504_v9  ;;  %v394_v12 = vld [vmem:[%s1446_s27 + $0x20] sm:$0xff]  ;;  %v500_v14 = vld [vmem:[%s1973_s2 + $0x50] sm:$0xff]  ;;  %565 = vst [vmem:[#allocation2] sm:$0xff] %v1362_v53 }
  0x10   : > { %447 = vmatpush.msra.mxu0 %v399_v2  ;;  %v499_v15 = vld [vmem:[%s1973_s2 + $0x48] sm:$0xff]  ;;  %v498_v16 = vld [vmem:[%s1973_s2 + $0x40] sm:$0xff]  ;;  %v497_v18 = vld [vmem:[%s1973_s2 + $0x38] sm:$0xff]  ;;  %568 = vst [vmem:[#allocation2 + $0x18] sm:$0xff] %v1362_v53 }
  0x11   : > { %510 = vmatpush.msra.mxu1 %v503_v10  ;;  %v395_v17 = vld [vmem:[%s1446_s27 + $0x28] sm:$0xff]  ;;  %v496_v19 = vld [vmem:[%s1973_s2 + $0x30] sm:$0xff]  ;;  %v494_v21 = vld [vmem:[%s1973_s2 + $0x20] sm:$0xff]  ;;  %569 = vst [vmem:[#allocation2 + $0x20] sm:$0xff] %v1362_v53 }
  0x12   : > { %448 = vmatpush.msra.mxu0 %v398_v3  ;;  %v495_v20 = vld [vmem:[%s1973_s2 + $0x28] sm:$0xff]  ;;  %v396_v22 = vld [vmem:[%s1446_s27 + $0x30] sm:$0xff]  ;;  %v493_v23 = vld [vmem:[%s1973_s2 + $0x18] sm:$0xff]  ;;  %570 = vst [vmem:[#allocation2 + $0x28] sm:$0xff] %v1362_v53 }
  0x13   : > { %1311 = vmatmul.msk.f32.vlgmr.msra.gmra.mxu0 %vm404_vm1, %v390_v4  ;;  %511 = vmatpush.msra.mxu1 %v502_v11  ;;  %v397_v24 = vld [vmem:[%s1446_s27 + $0x38] sm:$0xff]  ;;  %v492_v25 = vld [vmem:[%s1973_s2 + $0x10] sm:$0xff]  ;;  %v491_v26 = vld [vmem:[%s1973_s2 + $0x8] sm:$0xff]  ;;  %571 = vst [vmem:[#allocation2 + $0x30] sm:$0xff] %v1362_v53 }
  0x14   : > { %v490_v27 = vld [vmem:[%s1973_s2] sm:$0xff]  ;;  %v877_v54 = vld [vmem:[%s1975_s4 + $0x78] sm:$0xff]  ;;  %v876_v55 = vld [vmem:[%s1975_s4 + $0x70] sm:$0xff]  ;;  %572 = vst [vmem:[#allocation2 + $0x38] sm:$0xff] %v1362_v53 }
  0x15   : > { %512 = vmatpush.msra.mxu1 %v501_v13  ;;  %v1330_v28 = vld [vmem:[%s1978_s7] ss:$0 sm:$0xff]  ;;  %880 = vmatpush.msra.mxu2 %v877_v54  ;;  %v875_v56 = vld [vmem:[%s1975_s4 + $0x68] sm:$0xff]  ;;  %573 = vst [vmem:[#allocation2 + $0x40] sm:$0xff] %v1362_v53  ;;  %v873_v58 = vld [vmem:[%s1975_s4 + $0x58] sm:$0xff] }
  0x16   : > { %v874_v57 = vld [vmem:[%s1975_s4 + $0x60] sm:$0xff]  ;;  %574 = vst [vmem:[#allocation2 + $0x48] sm:$0xff] %v1362_v53  ;;  %v872_v59 = vld [vmem:[%s1975_s4 + $0x50] sm:$0xff]  ;;  %v871_v62 = vld [vmem:[%s1975_s4 + $0x48] sm:$0xff] }
  0x17   : > { %513 = vmatpush.msra.mxu1 %v500_v14  ;;  %881 = vmatpush.msra.mxu2 %v876_v55  ;;  %575 = vst [vmem:[#allocation2 + $0x50] sm:$0xff] %v1362_v53  ;;  %v600_v60 = vld [vmem:[#allocation2 + $0x1] sm:$0xff]  ;;  %v869_v0 = vld [vmem:[%s1975_s4 + $0x38] sm:$0xff]  ;;  %v868_v1 = vld [vmem:[%s1975_s4 + $0x30] sm:$0xff] }
  0x18   : > { %576 = vst [vmem:[#allocation2 + $0x58] sm:$0xff] %v1362_v53  ;;  %v604_v61 = vld [vmem:[#allocation2 + $0x2] sm:$0xff]  ;;  %v1614_v4 = vld [vmem:[%s1978_s7 + $0x1] ss:$0 sm:$0xff]  ;;  %v1629_v10 = vld [vmem:[%s1974_s3] ss:$0 sm:$0xff] }
  0x19   : > { %514 = vmatpush.msra.mxu1 %v499_v15  ;;  %882 = vmatpush.msra.mxu2 %v875_v56  ;;  %577 = vst [vmem:[#allocation2 + $0x60] sm:$0xf] %v1362_v53  ;;  %v870_v63 = vld [vmem:[%s1975_s4 + $0x40] sm:$0xff]  ;;  %v867_v2 = vld [vmem:[%s1975_s4 + $0x28] sm:$0xff]  ;;  %v598_v15 = vmul.f32 0.0, %v1629_v10 }
  0x1a   : > { %937 = vst [vmem:[#allocation2] sm:$0xff] %v1362_v53  ;;  %v866_v3 = vld [vmem:[%s1975_s4 + $0x20] sm:$0xff]  ;;  %v863_v9 = vld [vmem:[%s1975_s4 + $0x8] sm:$0xff] }
  0x1b   : > { %1312 = vmatmul.msk.f32.gmra.mxu0 %vm404_vm1, %v391_v5  ;;  %515 = vmatpush.msra.mxu1 %v498_v16  ;;  %v865_v5 = vld [vmem:[%s1975_s4 + $0x18] sm:$0xff]  ;;  %v1637_v13 = vld [vmem:[%s1974_s3 + $0x1] ss:$0 sm:$0xff] }
  0x1c   : > { %883 = vmatpush.msra.mxu2 %v874_v57  ;;  %v602_v16 = vmul.f32 %v1637_v13, %v600_v60 }
  0x1d   : > { %516 = vmatpush.msra.mxu1 %v497_v18 }
  0x1e   : > { %884 = vmatpush.msra.mxu2 %v873_v58  ;;  %v1685_v58 = vld [vmem:[%s1974_s3 + $0x8] ss:$0 sm:$0xff] }
  0x1f   : > { %517 = vmatpush.msra.mxu1 %v496_v19 }
  0x20   : > { %885 = vmatpush.msra.mxu2 %v872_v59 }
  0x21   : > { %518 = vmatpush.msra.mxu1 %v495_v20  ;;  %v603_v20 = vadd.f32 %v602_v16, %v598_v15 }
  0x22   : > { %886 = vmatpush.msra.mxu2 %v871_v62 }
  0x23   : > { %1313 = vmatmul.msk.f32.gmra.mxu0 %vm404_vm1, %v392_v6  ;;  %519 = vmatpush.msra.mxu1 %v494_v21  ;;  %v864_v6 = vld [vmem:[%s1975_s4 + $0x10] sm:$0xff] }
  0x24   : > { %887 = vmatpush.msra.mxu2 %v870_v63 }
  0x25   : > { %520 = vmatpush.msra.mxu1 %v493_v23  ;;  %v1651_v23 = vld [vmem:[%s1974_s3 + $0x3] ss:$0 sm:$0xff] }
  0x26   : > { %888 = vmatpush.msra.mxu2 %v869_v0 }
  0x27   : > { %521 = vmatpush.msra.mxu1 %v492_v25 }
  0x28   : > { %889 = vmatpush.msra.mxu2 %v868_v1 }
  0x29   : > { %522 = vmatpush.msra.mxu1 %v491_v26  ;;  %v1656_v26 = vld [vmem:[%s1974_s3 + $0x4] ss:$0 sm:$0xff] }
  0x2a   : > { %890 = vmatpush.msra.mxu2 %v867_v2 }
  0x2b   : > { %1314 = vmatmul.msk.f32.gmra.mxu0 %vm404_vm1, %v393_v7  ;;  %523 = vmatpush.msra.mxu1 %v490_v27 }
  0x2c   : > { %891 = vmatpush.msra.mxu2 %v866_v3 }
  0x2e   : > { %892 = vmatpush.msra.mxu2 %v865_v5 }
  0x30   : > { %893 = vmatpush.msra.mxu2 %v864_v6 }
  0x32   : > { %894 = vmatpush.msra.mxu2 %v863_v9 }
  0x33   : > { %1315 = vmatmul.msk.f32.gmra.mxu0 %vm404_vm1, %v394_v12  ;;  %v862_v12 = vld [vmem:[%s1975_s4] sm:$0xff] }
  0x34   : > { %895 = vmatpush.msra.mxu2 %v862_v12 }
  0x3b   : > { %1316 = vmatmul.msk.f32.gmra.mxu0 %vm404_vm1, %v395_v17  ;;  %v1644_v17 = vld [vmem:[%s1974_s3 + $0x2] ss:$0 sm:$0xff] }
  0x3c   : > { %v606_v21 = vmul.f32 %v1644_v17, %v604_v61 }
  0x3e   : > { %v607_v25 = vadd.f32 %v606_v21, %v603_v20 }
  0x43   : > { %1317 = vmatmul.msk.f32.gmra.mxu0 %vm404_vm1, %v396_v22 }
  0x4b   : > { %1318 = vmatmul.msk.f32.gmra.mxu0 %vm404_vm1, %v397_v24 }
  0x90   : > { %v450_v29 = vpop.f32.mrf.mxu0 }
  0x91   : > { %v451_v30 = vadd.f32 %v1330_v28, %v450_v29 }
  0x93   : > { %v1521_v31 = vmax.f32 %v451_v30, 0.0 }
  0x95   : > { %482 = vst [vmem:[%s1519_s11] sm:$0xff] %v1521_v31  ;;  %524 = vmatmul.f32.vlgmr.msra.gmra.mxu1 %v1521_v31 }
  0x98   : > { %v453_v32 = vpop.f32.mrf.mxu0 }
  0x99   : > { %v454_v33 = vadd.f32 %v1330_v28, %v453_v32 }
  0x9b   : > { %v1526_v34 = vmax.f32 %v454_v33, 0.0 }
  0x9d   : > { %483 = vst [vmem:[%s1519_s11 + $0x8] sm:$0xff] %v1526_v34  ;;  %527 = vmatmul.f32.gmra.mxu1 %v1526_v34 }
  0xa0   : > { %v456_v35 = vpop.f32.mrf.mxu0 }
  0xa1   : > { %v457_v36 = vadd.f32 %v1330_v28, %v456_v35 }
  0xa3   : > { %v1531_v37 = vmax.f32 %v457_v36, 0.0 }
  0xa5   : > { %484 = vst [vmem:[%s1519_s11 + $0x10] sm:$0xff] %v1531_v37  ;;  %530 = vmatmul.f32.gmra.mxu1 %v1531_v37 }
  0xa8   : > { %v459_v38 = vpop.f32.mrf.mxu0 }
  0xa9   : > { %v460_v39 = vadd.f32 %v1330_v28, %v459_v38  ;;  %v1666_v38 = vld [vmem:[%s1974_s3 + $0x5] ss:$0 sm:$0xff] }
  0xab   : > { %v1536_v40 = vmax.f32 %v460_v39, 0.0 }
  0xad   : > { %485 = vst [vmem:[%s1519_s11 + $0x18] sm:$0xff] %v1536_v40  ;;  %533 = vmatmul.f32.gmra.mxu1 %v1536_v40 }
  0xb0   : > { %v462_v41 = vpop.f32.mrf.mxu0 }
  0xb1   : > { %v463_v42 = vadd.f32 %v1330_v28, %v462_v41 }
  0xb3   : > { %v1541_v43 = vmax.f32 %v463_v42, 0.0 }
  0xb5   : > { %486 = vst [vmem:[%s1519_s11 + $0x20] sm:$0xff] %v1541_v43  ;;  %536 = vmatmul.f32.gmra.mxu1 %v1541_v43 }
  0xb8   : > { %v465_v44 = vpop.f32.mrf.mxu0 }
  0xb9   : > { %v466_v45 = vadd.f32 %v1330_v28, %v465_v44  ;;  %v1672_v44 = vld [vmem:[%s1974_s3 + $0x6] ss:$0 sm:$0xff] }
  0xbb   : > { %v1546_v46 = vmax.f32 %v466_v45, 0.0 }
  0xbd   : > { %487 = vst [vmem:[%s1519_s11 + $0x28] sm:$0xff] %v1546_v46  ;;  %539 = vmatmul.f32.gmra.mxu1 %v1546_v46 }
  0xc0   : > { %v468_v47 = vpop.f32.mrf.mxu0 }
  0xc1   : > { %v469_v48 = vadd.f32 %v1330_v28, %v468_v47  ;;  %v1677_v47 = vld [vmem:[%s1974_s3 + $0x7] ss:$0 sm:$0xff] }
  0xc3   : > { %v1551_v49 = vmax.f32 %v469_v48, 0.0 }
  0xc5   : > { %488 = vst [vmem:[%s1519_s11 + $0x30] sm:$0xff] %v1551_v49  ;;  %542 = vmatmul.f32.gmra.mxu1 %v1551_v49 }
  0xc8   : > { %v471_v50 = vpop.f32.mrf.mxu0 }
  0xc9   : > { %v472_v51 = vadd.f32 %v1330_v28, %v471_v50 }
  0xcb   : > { %v1556_v52 = vmax.f32 %v472_v51, 0.0 }
  0xcd   : > { %489 = vst [vmem:[%s1519_s11 + $0x38] sm:$0xff] %v1556_v52  ;;  %545 = vmatmul.f32.gmra.mxu1 %v1556_v52 }
 0x112   : > { %v525_v7 = vpop.f32.mrf.mxu1 }
 0x113   : > { %v526_v8 = vadd.f32 %v1614_v4, %v525_v7 }
 0x115   : > { %v549_v11 = vmax.f32 %v526_v8, 0.0 }
 0x117   : > { %v557_v14 = vmin.f32 %v549_v11, 6.0  ;;  %v1698_v11 = vld [vmem:[%s1978_s7 + $0x2] ss:$0 sm:$0xff] }
 0x119   : > { %578 = vst [vmem:[#allocation2 + $0xb] sm:$0xff] %v557_v14  ;;  %v614_v36 = vmul.f32 %v1656_v26, %v557_v14  ;;  %v641_v39 = vmul.f32 %v1637_v13, %v557_v14 }
 0x11a   : > { %v528_v18 = vpop.f32.mrf.mxu1 }
 0x11b   : > { %v529_v19 = vadd.f32 %v1614_v4, %v528_v18 }
 0x11d   : > { %v550_v22 = vmax.f32 %v529_v19, 0.0 }
 0x11f   : > { %v558_v24 = vmin.f32 %v550_v22, 6.0 }
 0x120   : > { %v608_v27 = vld [vmem:[#allocation2 + $0xa] sm:$0xff] }
 0x121   : > { %579 = vst [vmem:[#allocation2 + $0x15] sm:$0xff] %v558_v24  ;;  %v610_v28 = vmul.f32 %v1651_v23, %v608_v27  ;;  %v616_v29 = vld [vmem:[#allocation2 + $0xc] sm:$0xff]  ;;  %v638_v30 = vmul.f32 %v1629_v10, %v608_v27  ;;  %v626_v62 = vmul.f32 %v1677_v47, %v558_v24  ;;  %v672_v0 = vmul.f32 %v1637_v13, %v558_v24 }
 0x122   : > { %v531_v32 = vpop.f32.mrf.mxu1  ;;  %938 = vst [vmem:[#allocation2 + $0x8] sm:$0xff] %v1362_v53  ;;  %v618_v50 = vmul.f32 %v1666_v38, %v616_v29  ;;  %v644_v51 = vmul.f32 %v1644_v17, %v616_v29  ;;  %v650_v5 = vmul.f32 %v1656_v26, %v558_v24 }
 0x123   : > { %v532_v33 = vadd.f32 %v1614_v4, %v531_v32  ;;  %v611_v35 = vadd.f32 %v610_v28, %v607_v25  ;;  %v642_v45 = vadd.f32 %v641_v39, %v638_v30 }
 0x125   : > { %v551_v41 = vmax.f32 %v532_v33, 0.0  ;;  %v615_v42 = vadd.f32 %v614_v36, %v611_v35  ;;  %v645_v59 = vadd.f32 %v644_v51, %v642_v45 }
 0x127   : > { %v559_v48 = vmin.f32 %v551_v41, 6.0  ;;  %v619_v55 = vadd.f32 %v618_v50, %v615_v42 }
 0x128   : > { %v620_v54 = vld [vmem:[#allocation2 + $0x14] sm:$0xff] }
 0x129   : > { %580 = vst [vmem:[#allocation2 + $0x1f] sm:$0xff] %v559_v48  ;;  %v622_v56 = vmul.f32 %v1672_v44, %v620_v54  ;;  %v628_v57 = vld [vmem:[#allocation2 + $0x16] sm:$0xff]  ;;  %v647_v60 = vmul.f32 %v1651_v23, %v620_v54  ;;  %v669_v63 = vmul.f32 %v1629_v10, %v620_v54  ;;  %v659_v29 = vmul.f32 %v1677_v47, %v559_v48 }
 0x12a   : > { %v534_v61 = vpop.f32.mrf.mxu1  ;;  %939 = vst [vmem:[#allocation2 + $0x10] sm:$0xff] %v1362_v53  ;;  %v630_v9 = vmul.f32 %v1685_v58, %v628_v57  ;;  %v675_v14 = vmul.f32 %v1644_v17, %v628_v57  ;;  %v653_v18 = vmul.f32 %v1666_v38, %v628_v57  ;;  %v681_v30 = vmul.f32 %v1656_v26, %v559_v48 }
 0x12b   : > { %v535_v1 = vadd.f32 %v1614_v4, %v534_v61  ;;  %v623_v2 = vadd.f32 %v622_v56, %v619_v55  ;;  %v648_v3 = vadd.f32 %v647_v60, %v645_v59  ;;  %v673_v6 = vadd.f32 %v672_v0, %v669_v63 }
 0x12c   : > { %v703_v33 = vmul.f32 %v1637_v13, %v559_v48 }
 0x12d   : > { %v552_v7 = vmax.f32 %v535_v1, 0.0  ;;  %v627_v8 = vadd.f32 %v626_v62, %v623_v2  ;;  %v651_v12 = vadd.f32 %v650_v5, %v648_v3  ;;  %v676_v20 = vadd.f32 %v675_v14, %v673_v6 }
 0x12f   : > { %v560_v15 = vmin.f32 %v552_v7, 6.0  ;;  %v631_v16 = vadd.f32 %v630_v9, %v627_v8  ;;  %v654_v22 = vadd.f32 %v653_v18, %v651_v12 }
 0x130   : > { %v655_v19 = vld [vmem:[#allocation2 + $0x1e] sm:$0xff] }
 0x131   : > { %581 = vst [vmem:[#allocation2 + $0x29] sm:$0xff] %v560_v15  ;;  %v633_v21 = vadd.f32 %v1698_v11, %v631_v16  ;;  %v656_v24 = vmul.f32 %v1672_v44, %v655_v19  ;;  %v661_v25 = vld [vmem:[#allocation2 + $0x20] sm:$0xff]  ;;  %v678_v27 = vmul.f32 %v1651_v23, %v655_v19  ;;  %v700_v32 = vmul.f32 %v1629_v10, %v655_v19 }
 0x132   : > { %v537_v28 = vpop.f32.mrf.mxu1  ;;  %941 = vst [vmem:[#allocation2 + $0x20] sm:$0xff] %v1362_v53  ;;  %v662_v42 = vmul.f32 %v1685_v58, %v661_v25  ;;  %v706_v56 = vmul.f32 %v1644_v17, %v661_v25  ;;  %v684_v59 = vmul.f32 %v1666_v38, %v661_v25  ;;  %v690_v5 = vmul.f32 %v1677_v47, %v560_v15 }
 0x133   : > { %v538_v35 = vadd.f32 %v1614_v4, %v537_v28  ;;  %v634_v36 = vmax.f32 %v633_v21, 0.0  ;;  %v657_v39 = vadd.f32 %v656_v24, %v654_v22  ;;  %v679_v41 = vadd.f32 %v678_v27, %v676_v20  ;;  %940 = vst [vmem:[#allocation2 + $0x18] sm:$0xff] %v1362_v53 }
 0x134   : > { %v704_v45 = vadd.f32 %v703_v33, %v700_v32  ;;  %v712_v6 = vmul.f32 %v1656_v26, %v560_v15  ;;  %v734_v8 = vmul.f32 %v1637_v13, %v560_v15 }
 0x135   : > { %v553_v50 = vmax.f32 %v538_v35, 0.0  ;;  %v635_v51 = vmin.f32 %v634_v36, 6.0  ;;  %v660_v54 = vadd.f32 %v659_v29, %v657_v39  ;;  %v682_v55 = vadd.f32 %v681_v30, %v679_v41 }
 0x136   : > { %v707_v61 = vadd.f32 %v706_v56, %v704_v45 }
 0x137   : > { %v561_v57 = vmin.f32 %v553_v50, 6.0  ;;  %896 = vmatmul.f32.vlgmr.msra.gmra.mxu2 %v635_v51  ;;  %v663_v48 = vadd.f32 %v662_v42, %v660_v54  ;;  %v685_v63 = vadd.f32 %v684_v59, %v682_v55 }
 0x138   : > { %v686_v60 = vld [vmem:[#allocation2 + $0x28] sm:$0xff] }
 0x139   : > { %582 = vst [vmem:[#allocation2 + $0x33] sm:$0xff] %v561_v57  ;;  %v664_v62 = vadd.f32 %v1698_v11, %v663_v48  ;;  %v687_v0 = vmul.f32 %v1672_v44, %v686_v60  ;;  %v692_v1 = vld [vmem:[#allocation2 + $0x2a] sm:$0xff]  ;;  %v709_v2 = vmul.f32 %v1651_v23, %v686_v60  ;;  %v731_v7 = vmul.f32 %v1629_v10, %v686_v60 }
 0x13a   : > { %v540_v3 = vpop.f32.mrf.mxu1  ;;  %942 = vst [vmem:[#allocation2 + $0x28] sm:$0xff] %v1362_v53  ;;  %v693_v18 = vmul.f32 %v1685_v58, %v692_v1  ;;  %v737_v25 = vmul.f32 %v1644_v17, %v692_v1  ;;  %v715_v15 = vmul.f32 %v1666_v38, %v692_v1  ;;  %v721_v42 = vmul.f32 %v1677_v47, %v561_v57  ;;  %v1737_v1 = vld [vmem:[#allocation2 + $0x5a] sm:$0xff] }
 0x13b   : > { %v541_v9 = vadd.f32 %v1614_v4, %v540_v3  ;;  %v665_v12 = vmax.f32 %v664_v62, 0.0  ;;  %v688_v14 = vadd.f32 %v687_v0, %v685_v63  ;;  %v710_v16 = vadd.f32 %v709_v2, %v707_v61  ;;  %v1739_v2 = vld [vmem:[#allocation2 + $0x5b] sm:$0xff] }
 0x13c   : > { %v735_v19 = vadd.f32 %v734_v8, %v731_v7  ;;  %v743_v45 = vmul.f32 %v1656_v26, %v561_v57  ;;  %v765_v51 = vmul.f32 %v1637_v13, %v561_v57  ;;  %v1741_v3 = vld [vmem:[#allocation2 + $0x5c] sm:$0xff] }
 0x13d   : > { %v554_v20 = vmax.f32 %v541_v9, 0.0  ;;  %v666_v21 = vmin.f32 %v665_v12, 6.0  ;;  %v691_v22 = vadd.f32 %v690_v5, %v688_v14  ;;  %v713_v24 = vadd.f32 %v712_v6, %v710_v16  ;;  %949 = vst [vmem:[#allocation2 + $0x60] sm:$0xf] %v1362_v53 }
 0x13e   : > { %v738_v30 = vadd.f32 %v737_v25, %v735_v19 }
 0x13f   : > { %v562_v27 = vmin.f32 %v554_v20, 6.0  ;;  %899 = vmatmul.f32.gmra.mxu2 %v666_v21  ;;  %v694_v28 = vadd.f32 %v693_v18, %v691_v22  ;;  %v716_v33 = vadd.f32 %v715_v15, %v713_v24 }
 0x140   : > { %v717_v29 = vld [vmem:[#allocation2 + $0x32] sm:$0xff] }
 0x141   : > { %583 = vst [vmem:[#allocation2 + $0x3d] sm:$0xff] %v562_v27  ;;  %v695_v32 = vadd.f32 %v1698_v11, %v694_v28  ;;  %v718_v35 = vmul.f32 %v1672_v44, %v717_v29  ;;  %v723_v36 = vld [vmem:[#allocation2 + $0x34] sm:$0xff]  ;;  %v740_v39 = vmul.f32 %v1651_v23, %v717_v29  ;;  %v762_v50 = vmul.f32 %v1629_v10, %v717_v29 }
 0x142   : > { %v543_v41 = vpop.f32.mrf.mxu1  ;;  %943 = vst [vmem:[#allocation2 + $0x30] sm:$0xff] %v1362_v53  ;;  %v724_v59 = vmul.f32 %v1685_v58, %v723_v36  ;;  %v768_v57 = vmul.f32 %v1644_v17, %v723_v36  ;;  %v746_v7 = vmul.f32 %v1666_v38, %v723_v36  ;;  %v752_v21 = vmul.f32 %v1677_v47, %v562_v27 }
 0x143   : > { %v544_v54 = vadd.f32 %v1614_v4, %v543_v41  ;;  %v696_v55 = vmax.f32 %v695_v32, 0.0  ;;  %v719_v56 = vadd.f32 %v718_v35, %v716_v33  ;;  %v741_v48 = vadd.f32 %v740_v39, %v738_v30 }
 0x144   : > { %v766_v60 = vadd.f32 %v765_v51, %v762_v50  ;;  %v774_v22 = vmul.f32 %v1656_v26, %v562_v27  ;;  %v796_v25 = vmul.f32 %v1637_v13, %v562_v27 }
 0x145   : > { %v555_v61 = vmax.f32 %v544_v54, 0.0  ;;  %v697_v62 = vmin.f32 %v696_v55, 6.0  ;;  %v722_v63 = vadd.f32 %v721_v42, %v719_v56  ;;  %v744_v0 = vadd.f32 %v743_v45, %v741_v48 }
 0x146   : > { %v769_v9 = vadd.f32 %v768_v57, %v766_v60 }
 0x147   : > { %v563_v5 = vmin.f32 %v555_v61, 6.0  ;;  %902 = vmatmul.f32.gmra.mxu2 %v697_v62  ;;  %v725_v6 = vadd.f32 %v724_v59, %v722_v63  ;;  %v747_v14 = vadd.f32 %v746_v7, %v744_v0 }
 0x148   : > { %v748_v8 = vld [vmem:[#allocation2 + $0x3c] sm:$0xff] }
 0x149   : > { %584 = vst [vmem:[#allocation2 + $0x47] sm:$0xff] %v563_v5  ;;  %v726_v12 = vadd.f32 %v1698_v11, %v725_v6  ;;  %v749_v16 = vmul.f32 %v1672_v44, %v748_v8  ;;  %v754_v18 = vld [vmem:[#allocation2 + $0x3e] sm:$0xff]  ;;  %v771_v19 = vmul.f32 %v1651_v23, %v748_v8  ;;  %v793_v24 = vmul.f32 %v1629_v10, %v748_v8 }
 0x14a   : > { %v546_v20 = vpop.f32.mrf.mxu1  ;;  %944 = vst [vmem:[#allocation2 + $0x38] sm:$0xff] %v1362_v53  ;;  %v755_v32 = vmul.f32 %v1685_v58, %v754_v18  ;;  %v799_v42 = vmul.f32 %v1644_v17, %v754_v18  ;;  %v777_v27 = vmul.f32 %v1666_v38, %v754_v18  ;;  %v783_v60 = vmul.f32 %v1677_v47, %v563_v5 }
 0x14b   : > { %v547_v28 = vadd.f32 %v1614_v4, %v546_v20  ;;  %v727_v15 = vmax.f32 %v726_v12, 0.0  ;;  %v750_v29 = vadd.f32 %v749_v16, %v747_v14  ;;  %v772_v30 = vadd.f32 %v771_v19, %v769_v9 }
 0x14c   : > { %v797_v33 = vadd.f32 %v796_v25, %v793_v24  ;;  %v827_v62 = vmul.f32 %v1637_v13, %v563_v5  ;;  %v805_v6 = vmul.f32 %v1656_v26, %v563_v5 }
 0x14d   : > { %v556_v35 = vmax.f32 %v547_v28, 0.0  ;;  %v728_v36 = vmin.f32 %v727_v15, 6.0  ;;  %v753_v39 = vadd.f32 %v752_v21, %v750_v29  ;;  %v775_v41 = vadd.f32 %v774_v22, %v772_v30 }
 0x14e   : > { %v800_v54 = vadd.f32 %v799_v42, %v797_v33 }
 0x14f   : > { %v564_v45 = vmin.f32 %v556_v35, 6.0  ;;  %905 = vmatmul.f32.gmra.mxu2 %v728_v36  ;;  %v756_v50 = vadd.f32 %v755_v32, %v753_v39  ;;  %v778_v55 = vadd.f32 %v777_v27, %v775_v41  ;;  %v842_v32 = vmul.f32 %v1672_v44, %v1737_v1 }
 0x150   : > { %v779_v51 = vld [vmem:[#allocation2 + $0x46] sm:$0xff] }
 0x151   : > { %585 = vst [vmem:[#allocation2 + $0x51] sm:$0xff] %v564_v45  ;;  %v757_v4 = vadd.f32 %v1698_v11, %v756_v50  ;;  %v780_v56 = vmul.f32 %v1672_v44, %v779_v51  ;;  %v785_v48 = vld [vmem:[#allocation2 + $0x48] sm:$0xff]  ;;  %v802_v59 = vmul.f32 %v1651_v23, %v779_v51  ;;  %v824_v61 = vmul.f32 %v1629_v10, %v779_v51 }
 0x152   : > { %946 = vst [vmem:[#allocation2 + $0x48] sm:$0xff] %v1362_v53  ;;  %v786_v12 = vmul.f32 %v1685_v58, %v785_v48  ;;  %v830_v16 = vmul.f32 %v1644_v17, %v785_v48  ;;  %v808_v13 = vmul.f32 %v1666_v38, %v785_v48  ;;  %v814_v25 = vmul.f32 %v1677_v47, %v564_v45  ;;  %v973_v48 = vld [vmem:[#allocation2 + $0x1] ss:$2 sm:$0xf] }
 0x153   : > { %v758_v63 = vmax.f32 %v757_v4, 0.0  ;;  %v781_v0 = vadd.f32 %v780_v56, %v778_v55  ;;  %v803_v57 = vadd.f32 %v802_v59, %v800_v54  ;;  %945 = vst [vmem:[#allocation2 + $0x40] sm:$0xff] %v1362_v53  ;;  %v828_v7 = vadd.f32 %v827_v62, %v824_v61  ;;  %v1806_v4 = vld [vmem:[%s1976_s5 + $0x1] ss:$0 sm:$0xff]  ;;  %v1143_v59 = vld [vmem:[%s1977_s6 + $0x68] sm:$0xff] }
 0x154   : > { %v836_v29 = vmul.f32 %v1656_v26, %v564_v45  ;;  %v848_v26 = vmul.f32 %v1685_v58, %v1741_v3  ;;  %v968_v56 = vld [vmem:[#allocation2] ss:$2 sm:$0xf] }
 0x155   : > { %v759_v8 = vmin.f32 %v758_v63, 6.0  ;;  %v784_v9 = vadd.f32 %v783_v60, %v781_v0  ;;  %v806_v14 = vadd.f32 %v805_v6, %v803_v57  ;;  %v831_v20 = vadd.f32 %v830_v16, %v828_v7  ;;  %v1142_v61 = vld [vmem:[%s1977_s6 + $0x60] sm:$0xff]  ;;  %v1140_v6 = vld [vmem:[%s1977_s6 + $0x50] sm:$0xff] }
 0x156   : > { %v975_v63 = vmul.f32 %v1806_v4, %v973_v48  ;;  %v1827_v0 = vld [vmem:[%s1976_s5 + $0x2] ss:$0 sm:$0xff]  ;;  %v1844_v16 = vld [vmem:[%s1976_s5 + $0x3] ss:$0 sm:$0xff] }
 0x157   : > { %908 = vmatmul.f32.gmra.mxu2 %v759_v8  ;;  %v787_v10 = vadd.f32 %v786_v12, %v784_v9  ;;  %v809_v5 = vadd.f32 %v808_v13, %v806_v14  ;;  %v978_v57 = vld [vmem:[#allocation2 + $0x2] ss:$2 sm:$0xf] }
 0x158   : > { %v810_v18 = vld [vmem:[#allocation2 + $0x50] sm:$0xff]  ;;  %v980_v9 = vmul.f32 %v1827_v0, %v978_v57  ;;  %v1139_v14 = vld [vmem:[%s1977_s6 + $0x48] sm:$0xff]  ;;  %v1138_v13 = vld [vmem:[%s1977_s6 + $0x40] sm:$0xff] }
 0x159   : > { %v816_v19 = vld [vmem:[#allocation2 + $0x52] sm:$0xff]  ;;  %v788_v21 = vadd.f32 %v1698_v11, %v787_v10  ;;  %v811_v22 = vmul.f32 %v1672_v44, %v810_v18  ;;  %v833_v24 = vmul.f32 %v1651_v23, %v810_v18 }
 0x15a   : > { %947 = vst [vmem:[#allocation2 + $0x50] sm:$0xff] %v1362_v53  ;;  %v817_v30 = vmul.f32 %v1685_v58, %v816_v19  ;;  %v839_v23 = vmul.f32 %v1666_v38, %v816_v19  ;;  %v1145_v58 = vld [vmem:[%s1977_s6 + $0x78] sm:$0xff]  ;;  %v1853_v19 = vld [vmem:[%s1976_s5 + $0x4] ss:$0 sm:$0xff] }
 0x15b   : > { %948 = vst [vmem:[#allocation2 + $0x58] sm:$0xff] %v1362_v53  ;;  %v789_v17 = vmax.f32 %v788_v21, 0.0  ;;  %v812_v28 = vadd.f32 %v811_v22, %v809_v5  ;;  %v834_v15 = vadd.f32 %v833_v24, %v831_v20  ;;  %v845_v53 = vmul.f32 %v1677_v47, %v1739_v2  ;;  %v1790_v47 = vld [vmem:[%s1978_s7 + $0x3] ss:$0 sm:$0xff]  ;;  %v1144_v2 = vld [vmem:[%s1977_s6 + $0x70] sm:$0xff]  ;;  %1148 = vmatpush.msra.mxu3 %v1145_v58  ;;  %v1137_v21 = vld [vmem:[%s1977_s6 + $0x38] sm:$0xff] }
 0x15d   : > { %v790_v33 = vmin.f32 %v789_v17, 6.0  ;;  %v815_v35 = vadd.f32 %v814_v25, %v812_v28  ;;  %v837_v36 = vadd.f32 %v836_v29, %v834_v15  ;;  %1149 = vmatpush.msra.mxu3 %v1144_v2  ;;  %v1867_v28 = vld [vmem:[%s1976_s5 + $0x5] ss:$0 sm:$0xff] }
 0x15f   : > { %911 = vmatmul.f32.gmra.mxu2 %v790_v33  ;;  %v818_v39 = vadd.f32 %v817_v30, %v815_v35  ;;  %v840_v41 = vadd.f32 %v839_v23, %v837_v36  ;;  %1150 = vmatpush.msra.mxu3 %v1143_v59  ;;  %v1135_v30 = vld [vmem:[%s1977_s6 + $0x28] sm:$0xff]  ;;  %v1876_v33 = vld [vmem:[%s1976_s5 + $0x6] ss:$0 sm:$0xff] }
 0x160   : > { %v1134_v36 = vld [vmem:[%s1977_s6 + $0x20] sm:$0xff] }
 0x161   : > { %v819_v42 = vadd.f32 %v1698_v11, %v818_v39  ;;  %v843_v50 = vadd.f32 %v842_v32, %v840_v41  ;;  %1151 = vmatpush.msra.mxu3 %v1142_v61  ;;  %v1886_v39 = vld [vmem:[%s1976_s5 + $0x7] ss:$0 sm:$0xff] }
 0x163   : > { %v820_v45 = vmax.f32 %v819_v42, 0.0  ;;  %v846_v27 = vadd.f32 %v845_v53, %v843_v50  ;;  %v1892_v53 = vld [vmem:[%s1976_s5 + $0x8] ss:$0 sm:$0xff]  ;;  %v1132_v42 = vld [vmem:[%s1977_s6 + $0x10] sm:$0xff] }
 0x165   : > { %v821_v44 = vmin.f32 %v820_v45, 6.0  ;;  %v849_v1 = vadd.f32 %v848_v26, %v846_v27 }
 0x167   : > { %914 = vmatmul.f32.gmra.mxu2 %v821_v44  ;;  %v850_v38 = vadd.f32 %v1698_v11, %v849_v1  ;;  %v1801_v11 = vld [vmem:[%s1976_s5] ss:$0 sm:$0xff] }
 0x168   : > { %v970_v62 = vmul.f32 %v1801_v11, %v968_v56  ;;  %v1131_v56 = vld [vmem:[%s1977_s6 + $0x8] sm:$0xff] }
 0x169   : > { %v851_v51 = vmax.f32 %v850_v38, 0.0 }
 0x16a   : > { %v976_v8 = vadd.f32 %v975_v63, %v970_v62  ;;  %v1130_v63 = vld [vmem:[%s1977_s6] sm:$0xff] }
 0x16b   : > { %v852_v54 = vmin.f32 %v851_v51, 6.0 }
 0x16c   : > { %v981_v18 = vadd.f32 %v980_v9, %v976_v8 }
 0x16f   : > { %917 = vmatmul.f32.gmra.mxu2 %v852_v54 }
 0x1ba   : > { %v897_v3 = vpop.f32.mrf.mxu2 }
 0x1bb   : > { %v898_v55 = vadd.f32 %v1790_v47, %v897_v3 }
 0x1bd   : > { %v921_v60 = vadd.f32 %v898_v55, %v1521_v31  ;;  %v1141_v31 = vld [vmem:[%s1977_s6 + $0x58] sm:$0xff] }
 0x1be   : > { %1152 = vmatpush.msra.mxu3 %v1141_v31 }
 0x1bf   : > { %929 = vst [vmem:[%s1813_s30] sm:$0xff] %v921_v60 }
 0x1c0   : > { %950 = vst [vmem:[#allocation2 + $0xb] sm:$0xff] %v921_v60  ;;  %1153 = vmatpush.msra.mxu3 %v1140_v6  ;;  %v1912_v60 = vld [vmem:[%s1978_s7 + $0x4] ss:$0 sm:$0xff] }
 0x1c2   : > { %v900_v7 = vpop.f32.mrf.mxu2  ;;  %1154 = vmatpush.msra.mxu3 %v1139_v14 }
 0x1c3   : > { %v901_v12 = vadd.f32 %v1790_v47, %v900_v7 }
 0x1c4   : > { %1155 = vmatpush.msra.mxu3 %v1138_v13 }
 0x1c5   : > { %v922_v10 = vadd.f32 %v901_v12, %v1526_v34  ;;  %v1136_v34 = vld [vmem:[%s1977_s6 + $0x30] sm:$0xff] }
 0x1c6   : > { %1156 = vmatpush.msra.mxu3 %v1137_v21 }
 0x1c7   : > { %930 = vst [vmem:[%s1813_s30 + $0x8] sm:$0xff] %v922_v10  ;;  %v983_v20 = vld [vmem:[#allocation2 + $0xa] ss:$2 sm:$0xf] }
 0x1c8   : > { %951 = vst [vmem:[#allocation2 + $0x15] sm:$0xff] %v922_v10  ;;  %v985_v5 = vmul.f32 %v1844_v16, %v983_v20  ;;  %v988_v22 = vld [vmem:[#allocation2 + $0xb] ss:$2 sm:$0xf]  ;;  %1157 = vmatpush.msra.mxu3 %v1136_v34 }
 0x1c9   : > { %v990_v17 = vmul.f32 %v1853_v19, %v988_v22  ;;  %v993_v29 = vld [vmem:[#allocation2 + $0xc] ss:$2 sm:$0xf] }
 0x1ca   : > { %v903_v24 = vpop.f32.mrf.mxu2  ;;  %v986_v25 = vadd.f32 %v985_v5, %v981_v18  ;;  %1158 = vmatpush.msra.mxu3 %v1135_v30  ;;  %v995_v23 = vmul.f32 %v1867_v28, %v993_v29 }
 0x1cb   : > { %v904_v15 = vadd.f32 %v1790_v47, %v903_v24 }
 0x1cc   : > { %v991_v32 = vadd.f32 %v990_v17, %v986_v25  ;;  %1159 = vmatpush.msra.mxu3 %v1134_v36 }
 0x1cd   : > { %v923_v35 = vadd.f32 %v904_v15, %v1531_v37  ;;  %v1133_v37 = vld [vmem:[%s1977_s6 + $0x18] sm:$0xff] }
 0x1ce   : > { %v996_v50 = vadd.f32 %v995_v23, %v991_v32  ;;  %1160 = vmatpush.msra.mxu3 %v1133_v37 }
 0x1cf   : > { %931 = vst [vmem:[%s1813_s30 + $0x10] sm:$0xff] %v923_v35  ;;  %v998_v41 = vld [vmem:[#allocation2 + $0x14] ss:$2 sm:$0xf] }
 0x1d0   : > { %952 = vst [vmem:[#allocation2 + $0x1f] sm:$0xff] %v923_v35  ;;  %v1000_v26 = vmul.f32 %v1876_v33, %v998_v41  ;;  %v1003_v45 = vld [vmem:[#allocation2 + $0x15] ss:$2 sm:$0xf]  ;;  %1161 = vmatpush.msra.mxu3 %v1132_v42 }
 0x1d1   : > { %v1008_v27 = vld [vmem:[#allocation2 + $0x16] ss:$2 sm:$0xf]  ;;  %v1005_v51 = vmul.f32 %v1886_v39, %v1003_v45  ;;  %v1020_v58 = vld [vmem:[#allocation2 + $0x15] ss:$2 sm:$0xf] }
 0x1d2   : > { %v1017_v44 = vld [vmem:[#allocation2 + $0x14] ss:$2 sm:$0xf]  ;;  %v906_v1 = vpop.f32.mrf.mxu2  ;;  %v1001_v38 = vadd.f32 %v1000_v26, %v996_v50  ;;  %v1021_v3 = vmul.f32 %v1806_v4, %v1020_v58  ;;  %v1010_v59 = vmul.f32 %v1892_v53, %v1008_v27  ;;  %1162 = vmatpush.msra.mxu3 %v1131_v56 }
 0x1d3   : > { %v1018_v54 = vmul.f32 %v1801_v11, %v1017_v44  ;;  %v907_v2 = vadd.f32 %v1790_v47, %v906_v1  ;;  %v1023_v55 = vld [vmem:[#allocation2 + $0x16] ss:$2 sm:$0xf] }
 0x1d4   : > { %v1006_v48 = vadd.f32 %v1005_v51, %v1001_v38  ;;  %v1024_v31 = vmul.f32 %v1827_v0, %v1023_v55  ;;  %1163 = vmatpush.msra.mxu3 %v1130_v63 }
 0x1d5   : > { %v924_v61 = vadd.f32 %v907_v2, %v1536_v40  ;;  %v1022_v62 = vadd.f32 %v1021_v3, %v1018_v54 }
 0x1d6   : > { %v1011_v57 = vadd.f32 %v1010_v59, %v1006_v48 }
 0x1d7   : > { %932 = vst [vmem:[%s1813_s30 + $0x18] sm:$0xff] %v924_v61  ;;  %v1027_v6 = vld [vmem:[#allocation2 + $0x1e] ss:$2 sm:$0xf]  ;;  %v1025_v8 = vadd.f32 %v1024_v31, %v1022_v62 }
 0x1d8   : > { %953 = vst [vmem:[#allocation2 + $0x29] sm:$0xff] %v924_v61  ;;  %v1013_v7 = vadd.f32 %v1912_v60, %v1011_v57  ;;  %v1028_v9 = vmul.f32 %v1844_v16, %v1027_v6  ;;  %v1031_v40 = vld [vmem:[#allocation2 + $0x1f] ss:$2 sm:$0xf] }
 0x1d9   : > { %v1032_v13 = vmul.f32 %v1853_v19, %v1031_v40  ;;  %v1035_v20 = vld [vmem:[#allocation2 + $0x20] ss:$2 sm:$0xf] }
 0x1da   : > { %v909_v12 = vpop.f32.mrf.mxu2  ;;  %v1014_v14 = vmax.f32 %v1013_v7, 0.0  ;;  %v1029_v10 = vadd.f32 %v1028_v9, %v1025_v8  ;;  %v1036_v22 = vmul.f32 %v1867_v28, %v1035_v20 }
 0x1db   : > { %v910_v18 = vadd.f32 %v1790_v47, %v909_v12 }
 0x1dc   : > { %v1015_v21 = vmin.f32 %v1014_v14, 6.0  ;;  %v1033_v34 = vadd.f32 %v1032_v13, %v1029_v10 }
 0x1dd   : > { %v925_v5 = vadd.f32 %v910_v18, %v1541_v43 }
 0x1de   : > { %1016 = vst [vmem:[#allocation4] sm:$0xf] %v1015_v21  ;;  %v1037_v25 = vadd.f32 %v1036_v22, %v1033_v34 }
 0x1df   : > { %933 = vst [vmem:[%s1813_s30 + $0x20] sm:$0xff] %v925_v5  ;;  %v1039_v24 = vld [vmem:[#allocation2 + $0x28] ss:$2 sm:$0xf] }
 0x1e0   : > { %954 = vst [vmem:[#allocation2 + $0x33] sm:$0xff] %v925_v5  ;;  %v1040_v17 = vmul.f32 %v1876_v33, %v1039_v24  ;;  %v1043_v15 = vld [vmem:[#allocation2 + $0x29] ss:$2 sm:$0xf] }
 0x1e1   : > { %v1047_v29 = vld [vmem:[#allocation2 + $0x2a] ss:$2 sm:$0xf]  ;;  %v1044_v36 = vmul.f32 %v1886_v39, %v1043_v15  ;;  %v1057_v43 = vld [vmem:[#allocation2 + $0x29] ss:$2 sm:$0xf] }
 0x1e2   : > { %v1054_v30 = vld [vmem:[#allocation2 + $0x28] ss:$2 sm:$0xf]  ;;  %v912_v32 = vpop.f32.mrf.mxu2  ;;  %v1041_v35 = vadd.f32 %v1040_v17, %v1037_v25  ;;  %v1058_v37 = vmul.f32 %v1806_v4, %v1057_v43  ;;  %v1048_v26 = vmul.f32 %v1892_v53, %v1047_v29 }
 0x1e3   : > { %v1055_v23 = vmul.f32 %v1801_v11, %v1054_v30  ;;  %v913_v41 = vadd.f32 %v1790_v47, %v912_v32  ;;  %v1060_v42 = vld [vmem:[#allocation2 + $0x2a] ss:$2 sm:$0xf] }
 0x1e4   : > { %v1045_v50 = vadd.f32 %v1044_v36, %v1041_v35  ;;  %v1061_v1 = vmul.f32 %v1827_v0, %v1060_v42 }
 0x1e5   : > { %v926_v45 = vadd.f32 %v913_v41, %v1546_v46  ;;  %v1059_v27 = vadd.f32 %v1058_v37, %v1055_v23 }
 0x1e6   : > { %v1049_v44 = vadd.f32 %v1048_v26, %v1045_v50 }
 0x1e7   : > { %934 = vst [vmem:[%s1813_s30 + $0x28] sm:$0xff] %v926_v45  ;;  %v1064_v38 = vld [vmem:[#allocation2 + $0x32] ss:$2 sm:$0xf]  ;;  %v1062_v54 = vadd.f32 %v1061_v1, %v1059_v27 }
 0x1e8   : > { %955 = vst [vmem:[#allocation2 + $0x3d] sm:$0xff] %v926_v45  ;;  %v1050_v51 = vadd.f32 %v1912_v60, %v1049_v44  ;;  %v1065_v58 = vmul.f32 %v1844_v16, %v1064_v38  ;;  %v1068_v2 = vld [vmem:[#allocation2 + $0x33] ss:$2 sm:$0xf] }
 0x1e9   : > { %v1069_v48 = vmul.f32 %v1853_v19, %v1068_v2  ;;  %v1072_v59 = vld [vmem:[#allocation2 + $0x34] ss:$2 sm:$0xf] }
 0x1ea   : > { %v915_v3 = vpop.f32.mrf.mxu2  ;;  %v1051_v55 = vmax.f32 %v1050_v51, 0.0  ;;  %v1066_v56 = vadd.f32 %v1065_v58, %v1062_v54  ;;  %v1073_v57 = vmul.f32 %v1867_v28, %v1072_v59 }
 0x1eb   : > { %v916_v46 = vadd.f32 %v1790_v47, %v915_v3 }
 0x1ec   : > { %v1052_v61 = vmin.f32 %v1051_v55, 6.0  ;;  %v1070_v62 = vadd.f32 %v1069_v48, %v1066_v56 }
 0x1ed   : > { %v927_v63 = vadd.f32 %v916_v46, %v1551_v49 }
 0x1ee   : > { %1053 = vst [vmem:[#allocation4 + $0x4] sm:$0xf] %v1052_v61  ;;  %v1074_v6 = vadd.f32 %v1073_v57, %v1070_v62 }
 0x1ef   : > { %935 = vst [vmem:[%s1813_s30 + $0x30] sm:$0xff] %v927_v63  ;;  %v1076_v31 = vld [vmem:[#allocation2 + $0x3c] ss:$2 sm:$0xf] }
 0x1f0   : > { %956 = vst [vmem:[#allocation2 + $0x47] sm:$0xff] %v927_v63  ;;  %v1077_v7 = vmul.f32 %v1876_v33, %v1076_v31  ;;  %v1080_v8 = vld [vmem:[#allocation2 + $0x3d] ss:$2 sm:$0xf] }
 0x1f1   : > { %v1084_v9 = vld [vmem:[#allocation2 + $0x3e] ss:$2 sm:$0xf]  ;;  %v1081_v10 = vmul.f32 %v1886_v39, %v1080_v8  ;;  %v1094_v49 = vld [vmem:[#allocation2 + $0x3d] ss:$2 sm:$0xf] }
 0x1f2   : > { %v1091_v40 = vld [vmem:[#allocation2 + $0x3c] ss:$2 sm:$0xf]  ;;  %v918_v12 = vpop.f32.mrf.mxu2  ;;  %v1078_v14 = vadd.f32 %v1077_v7, %v1074_v6  ;;  %v1095_v20 = vmul.f32 %v1806_v4, %v1094_v49  ;;  %v1085_v5 = vmul.f32 %v1892_v53, %v1084_v9 }
 0x1f3   : > { %v1092_v13 = vmul.f32 %v1801_v11, %v1091_v40  ;;  %v919_v18 = vadd.f32 %v1790_v47, %v918_v12  ;;  %v1097_v21 = vld [vmem:[#allocation2 + $0x3e] ss:$2 sm:$0xf] }
 0x1f4   : > { %v1082_v34 = vadd.f32 %v1081_v10, %v1078_v14  ;;  %v1098_v15 = vmul.f32 %v1827_v0, %v1097_v21 }
 0x1f5   : > { %v928_v22 = vadd.f32 %v919_v18, %v1556_v52  ;;  %v1128_v24 = vld [vmem:[#allocation4] sm:$0xff]  ;;  %v1096_v25 = vadd.f32 %v1095_v20, %v1092_v13 }
 0x1f6   : > { %1164 = vmatmul.f32.vlgmr.msra.gmra.mxu3 %v1128_v24  ;;  %v1086_v17 = vadd.f32 %v1085_v5, %v1082_v34 }
 0x1f7   : > { %936 = vst [vmem:[%s1813_s30 + $0x38] sm:$0xff] %v928_v22  ;;  %v1101_v29 = vld [vmem:[#allocation2 + $0x46] ss:$2 sm:$0xf]  ;;  %v1099_v47 = vadd.f32 %v1098_v15, %v1096_v25  ;;  %s1308_s30 = sshll.u32 %s1297_s14, 1 }
 0x1f8   : > { %957 = vst [vmem:[#allocation2 + $0x51] sm:$0xff] %v928_v22  ;;  %v1087_v11 = vadd.f32 %v1912_v60, %v1086_v17  ;;  %v1102_v4 = vmul.f32 %v1844_v16, %v1101_v29  ;;  %v1105_v30 = vld [vmem:[#allocation2 + $0x47] ss:$2 sm:$0xf]  ;;  %p385_p4 = scmp.lt.s32.totalorder %s1308_s30, 3 }
 0x1f9   : > { %v1106_v36 = vmul.f32 %v1853_v19, %v1105_v30  ;;  %v1109_v52 = vld [vmem:[#allocation2 + $0x48] ss:$2 sm:$0xf] }
 0x1fa   : > { %v1088_v32 = vmax.f32 %v1087_v11, 0.0  ;;  %v1103_v35 = vadd.f32 %v1102_v4, %v1099_v47  ;;  %v1110_v41 = vmul.f32 %v1867_v28, %v1109_v52  ;;  %s1985_s30 = smov (!%p385_p4, %s1308_s30), 3 }
 0x1fb   : > { %s1309_s22 = sshll.u32 %s1985_s30, 3 }
 0x1fc   : > { %v1089_v23 = vmin.f32 %v1088_v32, 6.0  ;;  %v1107_v43 = vadd.f32 %v1106_v36, %v1103_v35  ;;  %s388_s29 = scalar_lea.vmem %s1981_s10, %s1309_s22 }
 0x1fe   : > { %1090 = vst [vmem:[#allocation4 + $0x8] sm:$0xf] %v1089_v23  ;;  %v1111_v42 = vadd.f32 %v1110_v41, %v1107_v43 }
 0x1ff   : > { %v1113_v0 = vld [vmem:[#allocation2 + $0x50] ss:$2 sm:$0xf]  ;;  %v1117_v37 = vld [vmem:[#allocation2 + $0x51] ss:$2 sm:$0xf] }
 0x200   : > { %v1114_v50 = vmul.f32 %v1876_v33, %v1113_v0  ;;  %v1121_v26 = vld [vmem:[#allocation2 + $0x52] ss:$2 sm:$0xf]  ;;  %v1118_v16 = vmul.f32 %v1886_v39, %v1117_v37  ;;  %v1353_v33 = vld [vmem:[%s1978_s7 + $0x5] ss:$0 sm:$0xff] }
 0x201   : > { %v1122_v44 = vmul.f32 %v1892_v53, %v1121_v26 }
 0x202   : > { %v1115_v45 = vadd.f32 %v1114_v50, %v1111_v42 }
 0x204   : > { %v1119_v27 = vadd.f32 %v1118_v16, %v1115_v45 }
 0x206   : > { %v1123_v19 = vadd.f32 %v1122_v44, %v1119_v27 }
 0x208   : > { %v1124_v1 = vadd.f32 %v1912_v60, %v1123_v19 }
 0x20a   : > { %v1125_v38 = vmax.f32 %v1124_v1, 0.0 }
 0x20c   : > { %v1126_v51 = vmin.f32 %v1125_v38, 6.0 }
 0x20e   : > { %1127 = vst [vmem:[#allocation4 + $0xc] sm:$0xf] %v1126_v51 }
 0x215   : > { %v1129_v28 = vld [vmem:[#allocation4 + $0x8] sm:$0xff] }
 0x216   : > { %1167 = vmatmul.f32.gmra.mxu3 %v1129_v28 }
 0x279   : > { %v1165_v39 = vpop.f32.mrf.mxu3 }
 0x27a   : > { %v1166_v53 = vadd.f32 %v1353_v33, %v1165_v39 }
 0x27c   : > { %1171 = vst [vmem:[%s388_s29] sm:$0xff] %v1166_v53 }
 0x299   : > { %v1168_v60 = vpop.f32.mrf.mxu3 }
 0x29a   : > { %v1169_v54 = vadd.f32 %v1353_v33, %v1168_v60 }
 0x29c   : > { %1172 = vst [vmem:[%s388_s29 + $0x8] sm:$0xff] %v1169_v54 }
 0x29d PF: > { %s21_s13 = sadd.s32 1, %s1360_s13  }
 0x29e   : > { %p18_p5 = scmp.ge.s32.totalorder %s21_s13, 4  }
 0x2a0   :  { %20 = sbr.rel (!%p18_p5) target bundleno = 1 (0x1), region = 132 }

</bundles_post_ra>
